<compile_context>
chip_gen: v7x
topology: tpu7x:2x2x1
jax: 0.10.0
libtpu: 0.0.40
codegen_flags: <defaults>
</compile_context>

<pallas_src>
import functools
import math

import jax
import jax.numpy as jnp
from jax.experimental import pallas as pl
from jax.experimental.pallas import tpu as pltpu  # noqa: F401 (not needed at this size)

# ----------------------------- tiny BERT config -----------------------------
VOCAB = 100
HIDDEN = 32
N_LAYERS = 2
N_HEADS = 2
HEAD_DIM = HIDDEN // N_HEADS
INTERMEDIATE = 64
MAX_POS = 64
TYPE_VOCAB = 2
NUM_LABELS = 2
LN_EPS = 1e-12

SLAB_LANES = 128


def _round8(n):
    return (n + 7) // 8 * 8


def _build_slab_layout():
    """All parameters live in ONE lane-aligned f32 slab -> a single input DMA."""
    layout = {}
    row = 0

    def add(name, rows):
        nonlocal row
        layout[name] = row
        row = _round8(row + rows)

    add("word_emb", VOCAB)
    add("pos_emb", MAX_POS)
    add("type_emb", TYPE_VOCAB)
    add("emb_ln", 2)                       # rows: gamma, beta
    for l in range(N_LAYERS):
        add(f"wqkv{l}", HIDDEN)
        add(f"wo{l}", HIDDEN)
        add(f"wi{l}", HIDDEN)
        add(f"wf{l}", INTERMEDIATE)
        add(f"vec{l}", 8)                  # bqkv, bo, ln1g, ln1b, bi, bf, ln2g, ln2b
    add("pool_w", HIDDEN)
    add("cls_w", HIDDEN)
    add("tail", 2)                         # rows: pool_b, cls_b
    return layout, row


_LAY, _SLAB_ROWS = _build_slab_layout()


# ------------------------------ fused kernel --------------------------------
def _bert_kernel(ids_ref, seg_ref, mask_ref, labels_ref, slab_ref, out_ref, *,
                 batch, seq):
    f32, bf16 = jnp.float32, jnp.bfloat16
    rows = batch * seq
    scale = 1.0 / math.sqrt(HEAD_DIM)

    def wslice(name, nrows, ncols, dtype=bf16):
        r = _LAY[name]
        return slab_ref[r:r + nrows, 0:ncols].astype(dtype)

    def layernorm(t, g, b):
        mu = jnp.mean(t, axis=-1, keepdims=True)
        c = t - mu
        var = jnp.mean(c * c, axis=-1, keepdims=True)
        return c * jax.lax.rsqrt(var + LN_EPS) * g + b

    def gelu(t):
        # TODO(synk): tanh approximation of GELU (HF BERT default is exact erf).
        return 0.5 * t * (1.0 + jnp.tanh(
            0.7978845608028654 * (t + 0.044715 * t * t * t)))

    # ---- embeddings: gather-as-one-hot matmul, all tables VMEM-resident ----
    ids = ids_ref[...]                                                   # (rows,1) i32
    onehot = (jax.lax.broadcasted_iota(jnp.int32, (rows, VOCAB), 1)
              == ids).astype(f32)
    word_e = jnp.dot(onehot, wslice("word_emb", VOCAB, HIDDEN, f32),
                     preferred_element_type=f32)                         # (rows,H)
    pos_rows = wslice("pos_emb", seq, HIDDEN, f32)                       # (seq,H)
    pos_e = jnp.concatenate([pos_rows] * batch, axis=0)                  # (rows,H)
    seg = seg_ref[...].astype(f32)                                       # (rows,1)
    t0 = wslice("type_emb", 1, HIDDEN, f32)
    t1 = slab_ref[_LAY["type_emb"] + 1:_LAY["type_emb"] + 2, 0:HIDDEN]
    type_e = t0 + seg * (t1 - t0)                                        # (rows,H)
    embv = slab_ref[_LAY["emb_ln"]:_LAY["emb_ln"] + 2, 0:HIDDEN]
    x = layernorm(word_e + pos_e + type_e, embv[0:1, :], embv[1:2, :])   # (rows,H) f32

    # additive attention mask, HF convention, hoisted out of all loops
    add_mask = (1.0 - mask_ref[...].astype(f32)) * -10000.0              # (B,1,S)

    # ---- encoder layers: fully unrolled, everything stays in registers ----
    for l in range(N_LAYERS):
        vec = slab_ref[_LAY[f"vec{l}"]:_LAY[f"vec{l}"] + 8, :]           # (8,128)
        bqkv, bo = vec[0:1, 0:3 * HIDDEN], vec[1:2, 0:HIDDEN]
        ln1g, ln1b = vec[2:3, 0:HIDDEN], vec[3:4, 0:HIDDEN]
        bi, bff = vec[4:5, 0:INTERMEDIATE], vec[5:6, 0:HIDDEN]
        ln2g, ln2b = vec[6:7, 0:HIDDEN], vec[7:8, 0:HIDDEN]

        # fused QKV projection (bf16 MXU operands, f32 accumulation)
        qkv = jnp.dot(x.astype(bf16), wslice(f"wqkv{l}", HIDDEN, 3 * HIDDEN),
                      preferred_element_type=f32) + bqkv                 # (rows,3H)
        qkv3 = qkv.reshape(batch, seq, 3 * HIDDEN)

        # multi-head self-attention, batched over batch dim, ctx kept in vregs
        ctx_heads = []
        for h in range(N_HEADS):
            c0 = h * HEAD_DIM
            q = qkv3[:, :, c0:c0 + HEAD_DIM].astype(bf16)
            k = qkv3[:, :, HIDDEN + c0:HIDDEN + c0 + HEAD_DIM].astype(bf16)
            v = qkv3[:, :, 2 * HIDDEN + c0:2 * HIDDEN + c0 + HEAD_DIM].astype(bf16)
            s = jax.lax.dot_general(q, k, (((2,), (2,)), ((0,), (0,))),
                                    preferred_element_type=f32)          # (B,S,S)
            s = s * scale + add_mask
            s = s - jnp.max(s, axis=-1, keepdims=True)
            p = jnp.exp(s)
            p = p / jnp.sum(p, axis=-1, keepdims=True)                   # exact softmax
            ctx_heads.append(jax.lax.dot_general(
                p.astype(bf16), v, (((2,), (1,)), ((0,), (0,))),
                preferred_element_type=f32))                             # (B,S,dH)
        ctx = jnp.concatenate(ctx_heads, axis=-1).reshape(rows, HIDDEN)

        attn = jnp.dot(ctx.astype(bf16), wslice(f"wo{l}", HIDDEN, HIDDEN),
                       preferred_element_type=f32) + bo
        x = layernorm(attn + x, ln1g, ln1b)

        inter = gelu(jnp.dot(x.astype(bf16), wslice(f"wi{l}", HIDDEN, INTERMEDIATE),
                             preferred_element_type=f32) + bi)
        ffn = jnp.dot(inter.astype(bf16), wslice(f"wf{l}", INTERMEDIATE, HIDDEN),
                      preferred_element_type=f32) + bff
        x = layernorm(ffn + x, ln2g, ln2b)

    # ---- pooler ([CLS] rows picked in registers), classifier, softmax + CE ----
    cls_rows = jnp.concatenate(
        [x[b * seq:b * seq + 1, :] for b in range(batch)], axis=0)       # (B,H)
    tail = slab_ref[_LAY["tail"]:_LAY["tail"] + 2, :]
    pooled = jnp.tanh(
        jnp.dot(cls_rows.astype(bf16), wslice("pool_w", HIDDEN, HIDDEN),
                preferred_element_type=f32) + tail[0:1, 0:HIDDEN])
    logits = jnp.dot(pooled.astype(bf16), wslice("cls_w", HIDDEN, NUM_LABELS),
                     preferred_element_type=f32) + tail[1:2, 0:NUM_LABELS]

    m = jnp.max(logits, axis=-1, keepdims=True)
    e = jnp.exp(logits - m)
    denom = jnp.sum(e, axis=-1, keepdims=True)
    probs = e / denom
    log_probs = (logits - m) - jnp.log(denom)
    onehot_lbl = (jax.lax.broadcasted_iota(jnp.int32, (batch, NUM_LABELS), 1)
                  == labels_ref[...]).astype(f32)
    nll = -jnp.sum(onehot_lbl * log_probs, axis=-1, keepdims=True)       # (B,1)
    loss = jnp.sum(nll, axis=0, keepdims=True) * (1.0 / batch)           # (1,1)

    # single lane/sublane-dense output tile: [logits | probs | loss | zeros]
    packed = jnp.concatenate(
        [logits, probs, jnp.broadcast_to(loss, (batch, 1)),
         jnp.zeros((batch, SLAB_LANES - (2 * NUM_LABELS + 1)), f32)], axis=-1)
    pad_rows = out_ref.shape[0] - batch
    if pad_rows > 0:
        packed = jnp.concatenate(
            [packed, jnp.zeros((pad_rows, SLAB_LANES), f32)], axis=0)
    out_ref[...] = packed


# ------------------------------- parameters --------------------------------
def init_params(key):
    keys = iter(jax.random.split(key, 32))

    def nrm(shape, scale=0.02):
        return scale * jax.random.normal(next(keys), shape, dtype=jnp.float32)

    L = N_LAYERS
    return {
        "word_emb": nrm((VOCAB, HIDDEN)),
        "pos_emb": nrm((MAX_POS, HIDDEN)),
        "type_emb": nrm((TYPE_VOCAB, HIDDEN)),
        "emb_ln_g": jnp.ones((HIDDEN,), jnp.float32),
        "emb_ln_b": jnp.zeros((HIDDEN,), jnp.float32),
        "wqkv": nrm((L, HIDDEN, 3 * HIDDEN)),
        "bqkv": jnp.zeros((L, 3 * HIDDEN), jnp.float32),
        "wo": nrm((L, HIDDEN, HIDDEN)),
        "bo": jnp.zeros((L, HIDDEN), jnp.float32),
        "ln1_g": jnp.ones((L, HIDDEN), jnp.float32),
        "ln1_b": jnp.zeros((L, HIDDEN), jnp.float32),
        "wi": nrm((L, HIDDEN, INTERMEDIATE)),
        "bi": jnp.zeros((L, INTERMEDIATE), jnp.float32),
        "wf": nrm((L, INTERMEDIATE, HIDDEN)),
        "bf": jnp.zeros((L, HIDDEN), jnp.float32),
        "ln2_g": jnp.ones((L, HIDDEN), jnp.float32),
        "ln2_b": jnp.zeros((L, HIDDEN), jnp.float32),
        "pool_w": nrm((HIDDEN, HIDDEN)),
        "pool_b": jnp.zeros((HIDDEN,), jnp.float32),
        "cls_w": nrm((HIDDEN, NUM_LABELS)),
        "cls_b": jnp.zeros((NUM_LABELS,), jnp.float32),
    }


def pack_params(p):
    """Pack every parameter into one lane-aligned (rows, 128) f32 slab (one DMA)."""
    slab = jnp.zeros((_SLAB_ROWS, SLAB_LANES), jnp.float32)

    def put2d(slab, name, arr):
        arr = jnp.asarray(arr, jnp.float32)
        r = _LAY[name]
        return slab.at[r:r + arr.shape[0], 0:arr.shape[1]].set(arr)

    def row128(v):
        v = jnp.asarray(v, jnp.float32).reshape(-1)
        return jnp.pad(v, (0, SLAB_LANES - v.shape[0]))

    slab = put2d(slab, "word_emb", p["word_emb"])
    slab = put2d(slab, "pos_emb", p["pos_emb"])
    slab = put2d(slab, "type_emb", p["type_emb"])
    slab = put2d(slab, "emb_ln", jnp.stack([p["emb_ln_g"], p["emb_ln_b"]], 0))
    for l in range(N_LAYERS):
        slab = put2d(slab, f"wqkv{l}", p["wqkv"][l])
        slab = put2d(slab, f"wo{l}", p["wo"][l])
        slab = put2d(slab, f"wi{l}", p["wi"][l])
        slab = put2d(slab, f"wf{l}", p["wf"][l])
        vec = jnp.stack([row128(p["bqkv"][l]), row128(p["bo"][l]),
                         row128(p["ln1_g"][l]), row128(p["ln1_b"][l]),
                         row128(p["bi"][l]), row128(p["bf"][l]),
                         row128(p["ln2_g"][l]), row128(p["ln2_b"][l])], axis=0)
        slab = put2d(slab, f"vec{l}", vec)
    slab = put2d(slab, "pool_w", p["pool_w"])
    slab = put2d(slab, "cls_w", p["cls_w"])
    slab = put2d(slab, "tail", jnp.stack([row128(p["pool_b"]),
                                          row128(p["cls_b"])], 0))
    return slab


# --------------------------------- forward ---------------------------------
def bert_forward(slab, batch_seqs, batch_seq_masks, batch_seq_segments, labels):
    B, S = batch_seqs.shape
    out_rows = max(8, _round8(B))

    ids_col = batch_seqs.reshape(B * S, 1).astype(jnp.int32)
    seg_col = batch_seq_segments.reshape(B * S, 1).astype(jnp.int32)
    mask3 = batch_seq_masks.reshape(B, 1, S).astype(jnp.int32)
    labels_col = labels.reshape(B, 1).astype(jnp.int32)

    kernel = functools.partial(_bert_kernel, batch=B, seq=S)
    out = pl.pallas_call(
        kernel,
        out_shape=jax.ShapeDtypeStruct((out_rows, SLAB_LANES), jnp.float32),
    )(ids_col, seg_col, mask3, labels_col, slab)

    logits = out[:B, 0:NUM_LABELS]
    probs = out[:B, NUM_LABELS:2 * NUM_LABELS]
    loss = out[0, 2 * NUM_LABELS]
    return loss, logits, probs


# ----------------------------------- main -----------------------------------
if __name__ == "__main__":
    key = jax.random.PRNGKey(0)
    pkey, ikey, lkey = jax.random.split(key, 3)

    params = init_params(pkey)
    slab = pack_params(params)

    B, S = 2, 8
    batch_seqs = jax.random.randint(ikey, (B, S), 0, VOCAB, dtype=jnp.int32)
    batch_seq_masks = jnp.ones((B, S), dtype=jnp.int32).at[1, 6:].set(0)
    batch_seq_segments = jnp.zeros((B, S), dtype=jnp.int32).at[:, 4:].set(1)
    labels = jax.random.randint(lkey, (B,), 0, NUM_LABELS, dtype=jnp.int32)

    fwd = jax.jit(bert_forward)
    loss, logits, probabilities = fwd(
        slab, batch_seqs, batch_seq_masks, batch_seq_segments, labels)
    jax.block_until_ready((loss, logits, probabilities))

    assert logits.shape == (B, NUM_LABELS)
    assert probabilities.shape == (B, NUM_LABELS)
    assert bool(jnp.isfinite(loss))
    print("KERNEL_OK")
</pallas_src>

<mosaic_0001>
module attributes {stable_mosaic.version = 11 : i64} {
  func.func @_bert_kernel(%arg0: memref<16x1xi32, #tpu.memory_space<vmem>>, %arg1: memref<16x1xi32, #tpu.memory_space<vmem>>, %arg2: memref<2x1x8xi32, #tpu.memory_space<vmem>>, %arg3: memref<2x1xi32, #tpu.memory_space<vmem>>, %arg4: memref<592x128xf32, #tpu.memory_space<vmem>>, %arg5: memref<8x128xf32, #tpu.memory_space<vmem>>) attributes {dimension_semantics = [], scalar_prefetch = 0 : i64, scratch_operands = 0 : i64, tpu.core_type = #tpu.core_type<tc>} {
    %c0 = arith.constant 0 : index
    %c0_0 = arith.constant 0 : index
    %0 = vector.load %arg0[%c0, %c0_0] : memref<16x1xi32, #tpu.memory_space<vmem>>, vector<16x1xi32>
    %1 = tpu.iota {dimensions = array<i32: 1>} : vector<16x100xi32>
    %2 = vector.broadcast %0 : vector<16x1xi32> to vector<16x100xi32>
    %3 = arith.cmpi eq, %1, %2 : vector<16x100xi32>
    %4 = arith.extui %3 : vector<16x100xi1> to vector<16x100xi32>
    %5 = arith.sitofp %4 : vector<16x100xi32> to vector<16x100xf32>
    %c0_1 = arith.constant 0 : index
    %c0_2 = arith.constant 0 : index
    %6 = vector.load %arg4[%c0_1, %c0_2] : memref<592x128xf32, #tpu.memory_space<vmem>>, vector<100x32xf32>
    %cst = arith.constant dense<0.000000e+00> : vector<16x32xf32>
    %7 = tpu.matmul %5, %6, %cst {dimension_numbers = #tpu.dot_dimension_numbers<[1], [0], [0], [1], [0, 0, 1, 1], [], []>} : vector<16x100xf32>, vector<100x32xf32>, vector<16x32xf32> -> vector<16x32xf32>
    %c104 = arith.constant 104 : index
    %c0_3 = arith.constant 0 : index
    %8 = vector.load %arg4[%c104, %c0_3] : memref<592x128xf32, #tpu.memory_space<vmem>>, vector<8x32xf32>
    %9 = tpu.concatenate %8, %8 in 0 : vector<8x32xf32>, vector<8x32xf32> -> vector<16x32xf32>
    %c0_4 = arith.constant 0 : index
    %c0_5 = arith.constant 0 : index
    %10 = vector.load %arg1[%c0_4, %c0_5] : memref<16x1xi32, #tpu.memory_space<vmem>>, vector<16x1xi32>
    %11 = arith.sitofp %10 : vector<16x1xi32> to vector<16x1xf32>
    %c168 = arith.constant 168 : index
    %c0_6 = arith.constant 0 : index
    %12 = vector.load %arg4[%c168, %c0_6] : memref<592x128xf32, #tpu.memory_space<vmem>>, vector<1x32xf32>
    %c169 = arith.constant 169 : index
    %c0_7 = arith.constant 0 : index
    %13 = vector.load %arg4[%c169, %c0_7] : memref<592x128xf32, #tpu.memory_space<vmem>>, vector<1x32xf32>
    %14 = arith.subf %13, %12 : vector<1x32xf32>
    %15 = vector.broadcast %11 : vector<16x1xf32> to vector<16x32xf32>
    %16 = vector.broadcast %14 : vector<1x32xf32> to vector<16x32xf32>
    %17 = arith.mulf %15, %16 : vector<16x32xf32>
    %18 = vector.broadcast %12 : vector<1x32xf32> to vector<16x32xf32>
    %19 = arith.addf %18, %17 : vector<16x32xf32>
    %c176 = arith.constant 176 : index
    %c0_8 = arith.constant 0 : index
    %20 = vector.load %arg4[%c176, %c0_8] : memref<592x128xf32, #tpu.memory_space<vmem>>, vector<2x32xf32>
    %21 = arith.addf %7, %9 : vector<16x32xf32>
    %22 = arith.addf %21, %19 : vector<16x32xf32>
    %23 = vector.extract_strided_slice %20 {offsets = [0, 0], sizes = [1, 32], strides = [1, 1]} : vector<2x32xf32> to vector<1x32xf32>
    %24 = vector.extract_strided_slice %20 {offsets = [1, 0], sizes = [1, 32], strides = [1, 1]} : vector<2x32xf32> to vector<1x32xf32>
    %cst_9 = arith.constant dense<0.000000e+00> : vector<16xf32>
    %25 = vector.multi_reduction <add>, %22, %cst_9 [1] : vector<16x32xf32> to vector<16xf32>
    %26 = vector.shape_cast %25 : vector<16xf32> to vector<16x1xf32>
    %cst_10 = arith.constant 3.200000e+01 : f32
    %27 = vector.broadcast %cst_10 : f32 to vector<16x1xf32>
    %28 = arith.divf %26, %27 : vector<16x1xf32>
    %29 = vector.broadcast %28 : vector<16x1xf32> to vector<16x32xf32>
    %30 = arith.subf %22, %29 : vector<16x32xf32>
    %31 = arith.mulf %30, %30 : vector<16x32xf32>
    %cst_11 = arith.constant dense<0.000000e+00> : vector<16xf32>
    %32 = vector.multi_reduction <add>, %31, %cst_11 [1] : vector<16x32xf32> to vector<16xf32>
    %33 = vector.shape_cast %32 : vector<16xf32> to vector<16x1xf32>
    %cst_12 = arith.constant 3.200000e+01 : f32
    %34 = vector.broadcast %cst_12 : f32 to vector<16x1xf32>
    %35 = arith.divf %33, %34 : vector<16x1xf32>
    %cst_13 = arith.constant 9.99999996E-13 : f32
    %36 = vector.broadcast %cst_13 : f32 to vector<16x1xf32>
    %37 = arith.addf %35, %36 : vector<16x1xf32>
    %38 = math.rsqrt %37 : vector<16x1xf32>
    %39 = vector.broadcast %38 : vector<16x1xf32> to vector<16x32xf32>
    %40 = arith.mulf %30, %39 : vector<16x32xf32>
    %41 = vector.broadcast %23 : vector<1x32xf32> to vector<16x32xf32>
    %42 = arith.mulf %40, %41 : vector<16x32xf32>
    %43 = vector.broadcast %24 : vector<1x32xf32> to vector<16x32xf32>
    %44 = arith.addf %42, %43 : vector<16x32xf32>
    %c0_14 = arith.constant 0 : index
    %c0_15 = arith.constant 0 : index
    %c0_16 = arith.constant 0 : index
    %45 = vector.load %arg2[%c0_14, %c0_15, %c0_16] : memref<2x1x8xi32, #tpu.memory_space<vmem>>, vector<2x1x8xi32>
    %46 = arith.sitofp %45 : vector<2x1x8xi32> to vector<2x1x8xf32>
    %cst_17 = arith.constant 1.000000e+00 : f32
    %47 = vector.broadcast %cst_17 : f32 to vector<2x1x8xf32>
    %48 = arith.subf %47, %46 : vector<2x1x8xf32>
    %cst_18 = arith.constant -1.000000e+04 : f32
    %49 = vector.broadcast %cst_18 : f32 to vector<2x1x8xf32>
    %50 = arith.mulf %48, %49 : vector<2x1x8xf32>
    %c344 = arith.constant 344 : index
    %c0_19 = arith.constant 0 : index
    %51 = vector.load %arg4[%c344, %c0_19] : memref<592x128xf32, #tpu.memory_space<vmem>>, vector<8x128xf32>
    %52 = vector.extract_strided_slice %51 {offsets = [0, 0], sizes = [1, 96], strides = [1, 1]} : vector<8x128xf32> to vector<1x96xf32>
    %53 = vector.extract_strided_slice %51 {offsets = [1, 0], sizes = [1, 32], strides = [1, 1]} : vector<8x128xf32> to vector<1x32xf32>
    %54 = vector.extract_strided_slice %51 {offsets = [2, 0], sizes = [1, 32], strides = [1, 1]} : vector<8x128xf32> to vector<1x32xf32>
    %55 = vector.extract_strided_slice %51 {offsets = [3, 0], sizes = [1, 32], strides = [1, 1]} : vector<8x128xf32> to vector<1x32xf32>
    %56 = vector.extract_strided_slice %51 {offsets = [4, 0], sizes = [1, 64], strides = [1, 1]} : vector<8x128xf32> to vector<1x64xf32>
    %57 = vector.extract_strided_slice %51 {offsets = [5, 0], sizes = [1, 32], strides = [1, 1]} : vector<8x128xf32> to vector<1x32xf32>
    %58 = vector.extract_strided_slice %51 {offsets = [6, 0], sizes = [1, 32], strides = [1, 1]} : vector<8x128xf32> to vector<1x32xf32>
    %59 = vector.extract_strided_slice %51 {offsets = [7, 0], sizes = [1, 32], strides = [1, 1]} : vector<8x128xf32> to vector<1x32xf32>
    %60 = arith.truncf %44 : vector<16x32xf32> to vector<16x32xbf16>
    %c184 = arith.constant 184 : index
    %c0_20 = arith.constant 0 : index
    %61 = vector.load %arg4[%c184, %c0_20] : memref<592x128xf32, #tpu.memory_space<vmem>>, vector<32x96xf32>
    %62 = arith.truncf %61 : vector<32x96xf32> to vector<32x96xbf16>
    %cst_21 = arith.constant dense<0.000000e+00> : vector<16x96xf32>
    %63 = tpu.matmul %60, %62, %cst_21 {dimension_numbers = #tpu.dot_dimension_numbers<[1], [0], [0], [1], [0, 0, 1, 1], [], []>} : vector<16x32xbf16>, vector<32x96xbf16>, vector<16x96xf32> -> vector<16x96xf32>
    %64 = vector.broadcast %52 : vector<1x96xf32> to vector<16x96xf32>
    %65 = arith.addf %63, %64 : vector<16x96xf32>
    %66 = vector.shape_cast %65 : vector<16x96xf32> to vector<2x8x96xf32>
    %67 = vector.extract_strided_slice %66 {offsets = [0, 0, 0], sizes = [2, 8, 16], strides = [1, 1, 1]} : vector<2x8x96xf32> to vector<2x8x16xf32>
    %68 = arith.truncf %67 : vector<2x8x16xf32> to vector<2x8x16xbf16>
    %69 = vector.extract_strided_slice %66 {offsets = [0, 0, 32], sizes = [2, 8, 16], strides = [1, 1, 1]} : vector<2x8x96xf32> to vector<2x8x16xf32>
    %70 = arith.truncf %69 : vector<2x8x16xf32> to vector<2x8x16xbf16>
    %71 = vector.extract_strided_slice %66 {offsets = [0, 0, 64], sizes = [2, 8, 16], strides = [1, 1, 1]} : vector<2x8x96xf32> to vector<2x8x16xf32>
    %72 = arith.truncf %71 : vector<2x8x16xf32> to vector<2x8x16xbf16>
    %cst_22 = arith.constant dense<0.000000e+00> : vector<2x8x8xf32>
    %73 = tpu.matmul %68, %70, %cst_22 {dimension_numbers = #tpu.dot_dimension_numbers<[2], [2], [1], [1], [0, 0, 0, 1, 1, 1], [0], [0]>} : vector<2x8x16xbf16>, vector<2x8x16xbf16>, vector<2x8x8xf32> -> vector<2x8x8xf32>
    %cst_23 = arith.constant 2.500000e-01 : f32
    %74 = vector.broadcast %cst_23 : f32 to vector<2x8x8xf32>
    %75 = arith.mulf %73, %74 : vector<2x8x8xf32>
    %76 = vector.broadcast %50 : vector<2x1x8xf32> to vector<2x8x8xf32>
    %77 = arith.addf %75, %76 : vector<2x8x8xf32>
    %cst_24 = arith.constant dense<0xFF800000> : vector<2x8xf32>
    %78 = vector.multi_reduction <maximumf>, %77, %cst_24 [2] : vector<2x8x8xf32> to vector<2x8xf32>
    %79 = vector.shape_cast %78 : vector<2x8xf32> to vector<2x8x1xf32>
    %80 = vector.broadcast %79 : vector<2x8x1xf32> to vector<2x8x8xf32>
    %81 = arith.subf %77, %80 : vector<2x8x8xf32>
    %82 = math.exp %81 : vector<2x8x8xf32>
    %cst_25 = arith.constant dense<0.000000e+00> : vector<2x8xf32>
    %83 = vector.multi_reduction <add>, %82, %cst_25 [2] : vector<2x8x8xf32> to vector<2x8xf32>
    %84 = vector.shape_cast %83 : vector<2x8xf32> to vector<2x8x1xf32>
    %85 = vector.broadcast %84 : vector<2x8x1xf32> to vector<2x8x8xf32>
    %86 = arith.divf %82, %85 : vector<2x8x8xf32>
    %87 = arith.truncf %86 : vector<2x8x8xf32> to vector<2x8x8xbf16>
    %cst_26 = arith.constant dense<0.000000e+00> : vector<2x8x16xf32>
    %88 = tpu.matmul %87, %72, %cst_26 {dimension_numbers = #tpu.dot_dimension_numbers<[2], [1], [1], [2], [0, 0, 0, 1, 1, 2], [0], [0]>} : vector<2x8x8xbf16>, vector<2x8x16xbf16>, vector<2x8x16xf32> -> vector<2x8x16xf32>
    %89 = vector.extract_strided_slice %66 {offsets = [0, 0, 16], sizes = [2, 8, 16], strides = [1, 1, 1]} : vector<2x8x96xf32> to vector<2x8x16xf32>
    %90 = arith.truncf %89 : vector<2x8x16xf32> to vector<2x8x16xbf16>
    %91 = vector.extract_strided_slice %66 {offsets = [0, 0, 48], sizes = [2, 8, 16], strides = [1, 1, 1]} : vector<2x8x96xf32> to vector<2x8x16xf32>
    %92 = arith.truncf %91 : vector<2x8x16xf32> to vector<2x8x16xbf16>
    %93 = vector.extract_strided_slice %66 {offsets = [0, 0, 80], sizes = [2, 8, 16], strides = [1, 1, 1]} : vector<2x8x96xf32> to vector<2x8x16xf32>
    %94 = arith.truncf %93 : vector<2x8x16xf32> to vector<2x8x16xbf16>
    %cst_27 = arith.constant dense<0.000000e+00> : vector<2x8x8xf32>
    %95 = tpu.matmul %90, %92, %cst_27 {dimension_numbers = #tpu.dot_dimension_numbers<[2], [2], [1], [1], [0, 0, 0, 1, 1, 1], [0], [0]>} : vector<2x8x16xbf16>, vector<2x8x16xbf16>, vector<2x8x8xf32> -> vector<2x8x8xf32>
    %cst_28 = arith.constant 2.500000e-01 : f32
    %96 = vector.broadcast %cst_28 : f32 to vector<2x8x8xf32>
    %97 = arith.mulf %95, %96 : vector<2x8x8xf32>
    %98 = vector.broadcast %50 : vector<2x1x8xf32> to vector<2x8x8xf32>
    %99 = arith.addf %97, %98 : vector<2x8x8xf32>
    %cst_29 = arith.constant dense<0xFF800000> : vector<2x8xf32>
    %100 = vector.multi_reduction <maximumf>, %99, %cst_29 [2] : vector<2x8x8xf32> to vector<2x8xf32>
    %101 = vector.shape_cast %100 : vector<2x8xf32> to vector<2x8x1xf32>
    %102 = vector.broadcast %101 : vector<2x8x1xf32> to vector<2x8x8xf32>
    %103 = arith.subf %99, %102 : vector<2x8x8xf32>
    %104 = math.exp %103 : vector<2x8x8xf32>
    %cst_30 = arith.constant dense<0.000000e+00> : vector<2x8xf32>
    %105 = vector.multi_reduction <add>, %104, %cst_30 [2] : vector<2x8x8xf32> to vector<2x8xf32>
    %106 = vector.shape_cast %105 : vector<2x8xf32> to vector<2x8x1xf32>
    %107 = vector.broadcast %106 : vector<2x8x1xf32> to vector<2x8x8xf32>
    %108 = arith.divf %104, %107 : vector<2x8x8xf32>
    %109 = arith.truncf %108 : vector<2x8x8xf32> to vector<2x8x8xbf16>
    %cst_31 = arith.constant dense<0.000000e+00> : vector<2x8x16xf32>
    %110 = tpu.matmul %109, %94, %cst_31 {dimension_numbers = #tpu.dot_dimension_numbers<[2], [1], [1], [2], [0, 0, 0, 1, 1, 2], [0], [0]>} : vector<2x8x8xbf16>, vector<2x8x16xbf16>, vector<2x8x16xf32> -> vector<2x8x16xf32>
    %111 = tpu.concatenate %88, %110 in 2 : vector<2x8x16xf32>, vector<2x8x16xf32> -> vector<2x8x32xf32>
    %112 = vector.shape_cast %111 : vector<2x8x32xf32> to vector<16x32xf32>
    %113 = arith.truncf %112 : vector<16x32xf32> to vector<16x32xbf16>
    %c216 = arith.constant 216 : index
    %c0_32 = arith.constant 0 : index
    %114 = vector.load %arg4[%c216, %c0_32] : memref<592x128xf32, #tpu.memory_space<vmem>>, vector<32x32xf32>
    %115 = arith.truncf %114 : vector<32x32xf32> to vector<32x32xbf16>
    %cst_33 = arith.constant dense<0.000000e+00> : vector<16x32xf32>
    %116 = tpu.matmul %113, %115, %cst_33 {dimension_numbers = #tpu.dot_dimension_numbers<[1], [0], [0], [1], [0, 0, 1, 1], [], []>} : vector<16x32xbf16>, vector<32x32xbf16>, vector<16x32xf32> -> vector<16x32xf32>
    %117 = vector.broadcast %53 : vector<1x32xf32> to vector<16x32xf32>
    %118 = arith.addf %116, %117 : vector<16x32xf32>
    %119 = arith.addf %118, %44 : vector<16x32xf32>
    %cst_34 = arith.constant dense<0.000000e+00> : vector<16xf32>
    %120 = vector.multi_reduction <add>, %119, %cst_34 [1] : vector<16x32xf32> to vector<16xf32>
    %121 = vector.shape_cast %120 : vector<16xf32> to vector<16x1xf32>
    %cst_35 = arith.constant 3.200000e+01 : f32
    %122 = vector.broadcast %cst_35 : f32 to vector<16x1xf32>
    %123 = arith.divf %121, %122 : vector<16x1xf32>
    %124 = vector.broadcast %123 : vector<16x1xf32> to vector<16x32xf32>
    %125 = arith.subf %119, %124 : vector<16x32xf32>
    %126 = arith.mulf %125, %125 : vector<16x32xf32>
    %cst_36 = arith.constant dense<0.000000e+00> : vector<16xf32>
    %127 = vector.multi_reduction <add>, %126, %cst_36 [1] : vector<16x32xf32> to vector<16xf32>
    %128 = vector.shape_cast %127 : vector<16xf32> to vector<16x1xf32>
    %cst_37 = arith.constant 3.200000e+01 : f32
    %129 = vector.broadcast %cst_37 : f32 to vector<16x1xf32>
    %130 = arith.divf %128, %129 : vector<16x1xf32>
    %cst_38 = arith.constant 9.99999996E-13 : f32
    %131 = vector.broadcast %cst_38 : f32 to vector<16x1xf32>
    %132 = arith.addf %130, %131 : vector<16x1xf32>
    %133 = math.rsqrt %132 : vector<16x1xf32>
    %134 = vector.broadcast %133 : vector<16x1xf32> to vector<16x32xf32>
    %135 = arith.mulf %125, %134 : vector<16x32xf32>
    %136 = vector.broadcast %54 : vector<1x32xf32> to vector<16x32xf32>
    %137 = arith.mulf %135, %136 : vector<16x32xf32>
    %138 = vector.broadcast %55 : vector<1x32xf32> to vector<16x32xf32>
    %139 = arith.addf %137, %138 : vector<16x32xf32>
    %140 = arith.truncf %139 : vector<16x32xf32> to vector<16x32xbf16>
    %c248 = arith.constant 248 : index
    %c0_39 = arith.constant 0 : index
    %141 = vector.load %arg4[%c248, %c0_39] : memref<592x128xf32, #tpu.memory_space<vmem>>, vector<32x64xf32>
    %142 = arith.truncf %141 : vector<32x64xf32> to vector<32x64xbf16>
    %cst_40 = arith.constant dense<0.000000e+00> : vector<16x64xf32>
    %143 = tpu.matmul %140, %142, %cst_40 {dimension_numbers = #tpu.dot_dimension_numbers<[1], [0], [0], [1], [0, 0, 1, 1], [], []>} : vector<16x32xbf16>, vector<32x64xbf16>, vector<16x64xf32> -> vector<16x64xf32>
    %144 = vector.broadcast %56 : vector<1x64xf32> to vector<16x64xf32>
    %145 = arith.addf %143, %144 : vector<16x64xf32>
    %cst_41 = arith.constant 5.000000e-01 : f32
    %146 = vector.broadcast %cst_41 : f32 to vector<16x64xf32>
    %147 = arith.mulf %146, %145 : vector<16x64xf32>
    %cst_42 = arith.constant 4.471500e-02 : f32
    %148 = vector.broadcast %cst_42 : f32 to vector<16x64xf32>
    %149 = arith.mulf %148, %145 : vector<16x64xf32>
    %150 = arith.mulf %149, %145 : vector<16x64xf32>
    %151 = arith.mulf %150, %145 : vector<16x64xf32>
    %152 = arith.addf %145, %151 : vector<16x64xf32>
    %cst_43 = arith.constant 0.797884583 : f32
    %153 = vector.broadcast %cst_43 : f32 to vector<16x64xf32>
    %154 = arith.mulf %153, %152 : vector<16x64xf32>
    %155 = math.tanh %154 : vector<16x64xf32>
    %cst_44 = arith.constant 1.000000e+00 : f32
    %156 = vector.broadcast %cst_44 : f32 to vector<16x64xf32>
    %157 = arith.addf %156, %155 : vector<16x64xf32>
    %158 = arith.mulf %147, %157 : vector<16x64xf32>
    %159 = arith.truncf %158 : vector<16x64xf32> to vector<16x64xbf16>
    %c280 = arith.constant 280 : index
    %c0_45 = arith.constant 0 : index
    %160 = vector.load %arg4[%c280, %c0_45] : memref<592x128xf32, #tpu.memory_space<vmem>>, vector<64x32xf32>
    %161 = arith.truncf %160 : vector<64x32xf32> to vector<64x32xbf16>
    %cst_46 = arith.constant dense<0.000000e+00> : vector<16x32xf32>
    %162 = tpu.matmul %159, %161, %cst_46 {dimension_numbers = #tpu.dot_dimension_numbers<[1], [0], [0], [1], [0, 0, 1, 1], [], []>} : vector<16x64xbf16>, vector<64x32xbf16>, vector<16x32xf32> -> vector<16x32xf32>
    %163 = vector.broadcast %57 : vector<1x32xf32> to vector<16x32xf32>
    %164 = arith.addf %162, %163 : vector<16x32xf32>
    %165 = arith.addf %164, %139 : vector<16x32xf32>
    %cst_47 = arith.constant dense<0.000000e+00> : vector<16xf32>
    %166 = vector.multi_reduction <add>, %165, %cst_47 [1] : vector<16x32xf32> to vector<16xf32>
    %167 = vector.shape_cast %166 : vector<16xf32> to vector<16x1xf32>
    %cst_48 = arith.constant 3.200000e+01 : f32
    %168 = vector.broadcast %cst_48 : f32 to vector<16x1xf32>
    %169 = arith.divf %167, %168 : vector<16x1xf32>
    %170 = vector.broadcast %169 : vector<16x1xf32> to vector<16x32xf32>
    %171 = arith.subf %165, %170 : vector<16x32xf32>
    %172 = arith.mulf %171, %171 : vector<16x32xf32>
    %cst_49 = arith.constant dense<0.000000e+00> : vector<16xf32>
    %173 = vector.multi_reduction <add>, %172, %cst_49 [1] : vector<16x32xf32> to vector<16xf32>
    %174 = vector.shape_cast %173 : vector<16xf32> to vector<16x1xf32>
    %cst_50 = arith.constant 3.200000e+01 : f32
    %175 = vector.broadcast %cst_50 : f32 to vector<16x1xf32>
    %176 = arith.divf %174, %175 : vector<16x1xf32>
    %cst_51 = arith.constant 9.99999996E-13 : f32
    %177 = vector.broadcast %cst_51 : f32 to vector<16x1xf32>
    %178 = arith.addf %176, %177 : vector<16x1xf32>
    %179 = math.rsqrt %178 : vector<16x1xf32>
    %180 = vector.broadcast %179 : vector<16x1xf32> to vector<16x32xf32>
    %181 = arith.mulf %171, %180 : vector<16x32xf32>
    %182 = vector.broadcast %58 : vector<1x32xf32> to vector<16x32xf32>
    %183 = arith.mulf %181, %182 : vector<16x32xf32>
    %184 = vector.broadcast %59 : vector<1x32xf32> to vector<16x32xf32>
    %185 = arith.addf %183, %184 : vector<16x32xf32>
    %c512 = arith.constant 512 : index
    %c0_52 = arith.constant 0 : index
    %186 = vector.load %arg4[%c512, %c0_52] : memref<592x128xf32, #tpu.memory_space<vmem>>, vector<8x128xf32>
    %187 = vector.extract_strided_slice %186 {offsets = [0, 0], sizes = [1, 96], strides = [1, 1]} : vector<8x128xf32> to vector<1x96xf32>
    %188 = vector.extract_strided_slice %186 {offsets = [1, 0], sizes = [1, 32], strides = [1, 1]} : vector<8x128xf32> to vector<1x32xf32>
    %189 = vector.extract_strided_slice %186 {offsets = [2, 0], sizes = [1, 32], strides = [1, 1]} : vector<8x128xf32> to vector<1x32xf32>
    %190 = vector.extract_strided_slice %186 {offsets = [3, 0], sizes = [1, 32], strides = [1, 1]} : vector<8x128xf32> to vector<1x32xf32>
    %191 = vector.extract_strided_slice %186 {offsets = [4, 0], sizes = [1, 64], strides = [1, 1]} : vector<8x128xf32> to vector<1x64xf32>
    %192 = vector.extract_strided_slice %186 {offsets = [5, 0], sizes = [1, 32], strides = [1, 1]} : vector<8x128xf32> to vector<1x32xf32>
    %193 = vector.extract_strided_slice %186 {offsets = [6, 0], sizes = [1, 32], strides = [1, 1]} : vector<8x128xf32> to vector<1x32xf32>
    %194 = vector.extract_strided_slice %186 {offsets = [7, 0], sizes = [1, 32], strides = [1, 1]} : vector<8x128xf32> to vector<1x32xf32>
    %195 = arith.truncf %185 : vector<16x32xf32> to vector<16x32xbf16>
    %c352 = arith.constant 352 : index
    %c0_53 = arith.constant 0 : index
    %196 = vector.load %arg4[%c352, %c0_53] : memref<592x128xf32, #tpu.memory_space<vmem>>, vector<32x96xf32>
    %197 = arith.truncf %196 : vector<32x96xf32> to vector<32x96xbf16>
    %cst_54 = arith.constant dense<0.000000e+00> : vector<16x96xf32>
    %198 = tpu.matmul %195, %197, %cst_54 {dimension_numbers = #tpu.dot_dimension_numbers<[1], [0], [0], [1], [0, 0, 1, 1], [], []>} : vector<16x32xbf16>, vector<32x96xbf16>, vector<16x96xf32> -> vector<16x96xf32>
    %199 = vector.broadcast %187 : vector<1x96xf32> to vector<16x96xf32>
    %200 = arith.addf %198, %199 : vector<16x96xf32>
    %201 = vector.shape_cast %200 : vector<16x96xf32> to vector<2x8x96xf32>
    %202 = vector.extract_strided_slice %201 {offsets = [0, 0, 0], sizes = [2, 8, 16], strides = [1, 1, 1]} : vector<2x8x96xf32> to vector<2x8x16xf32>
    %203 = arith.truncf %202 : vector<2x8x16xf32> to vector<2x8x16xbf16>
    %204 = vector.extract_strided_slice %201 {offsets = [0, 0, 32], sizes = [2, 8, 16], strides = [1, 1, 1]} : vector<2x8x96xf32> to vector<2x8x16xf32>
    %205 = arith.truncf %204 : vector<2x8x16xf32> to vector<2x8x16xbf16>
    %206 = vector.extract_strided_slice %201 {offsets = [0, 0, 64], sizes = [2, 8, 16], strides = [1, 1, 1]} : vector<2x8x96xf32> to vector<2x8x16xf32>
    %207 = arith.truncf %206 : vector<2x8x16xf32> to vector<2x8x16xbf16>
    %cst_55 = arith.constant dense<0.000000e+00> : vector<2x8x8xf32>
    %208 = tpu.matmul %203, %205, %cst_55 {dimension_numbers = #tpu.dot_dimension_numbers<[2], [2], [1], [1], [0, 0, 0, 1, 1, 1], [0], [0]>} : vector<2x8x16xbf16>, vector<2x8x16xbf16>, vector<2x8x8xf32> -> vector<2x8x8xf32>
    %cst_56 = arith.constant 2.500000e-01 : f32
    %209 = vector.broadcast %cst_56 : f32 to vector<2x8x8xf32>
    %210 = arith.mulf %208, %209 : vector<2x8x8xf32>
    %211 = vector.broadcast %50 : vector<2x1x8xf32> to vector<2x8x8xf32>
    %212 = arith.addf %210, %211 : vector<2x8x8xf32>
    %cst_57 = arith.constant dense<0xFF800000> : vector<2x8xf32>
    %213 = vector.multi_reduction <maximumf>, %212, %cst_57 [2] : vector<2x8x8xf32> to vector<2x8xf32>
    %214 = vector.shape_cast %213 : vector<2x8xf32> to vector<2x8x1xf32>
    %215 = vector.broadcast %214 : vector<2x8x1xf32> to vector<2x8x8xf32>
    %216 = arith.subf %212, %215 : vector<2x8x8xf32>
    %217 = math.exp %216 : vector<2x8x8xf32>
    %cst_58 = arith.constant dense<0.000000e+00> : vector<2x8xf32>
    %218 = vector.multi_reduction <add>, %217, %cst_58 [2] : vector<2x8x8xf32> to vector<2x8xf32>
    %219 = vector.shape_cast %218 : vector<2x8xf32> to vector<2x8x1xf32>
    %220 = vector.broadcast %219 : vector<2x8x1xf32> to vector<2x8x8xf32>
    %221 = arith.divf %217, %220 : vector<2x8x8xf32>
    %222 = arith.truncf %221 : vector<2x8x8xf32> to vector<2x8x8xbf16>
    %cst_59 = arith.constant dense<0.000000e+00> : vector<2x8x16xf32>
    %223 = tpu.matmul %222, %207, %cst_59 {dimension_numbers = #tpu.dot_dimension_numbers<[2], [1], [1], [2], [0, 0, 0, 1, 1, 2], [0], [0]>} : vector<2x8x8xbf16>, vector<2x8x16xbf16>, vector<2x8x16xf32> -> vector<2x8x16xf32>
    %224 = vector.extract_strided_slice %201 {offsets = [0, 0, 16], sizes = [2, 8, 16], strides = [1, 1, 1]} : vector<2x8x96xf32> to vector<2x8x16xf32>
    %225 = arith.truncf %224 : vector<2x8x16xf32> to vector<2x8x16xbf16>
    %226 = vector.extract_strided_slice %201 {offsets = [0, 0, 48], sizes = [2, 8, 16], strides = [1, 1, 1]} : vector<2x8x96xf32> to vector<2x8x16xf32>
    %227 = arith.truncf %226 : vector<2x8x16xf32> to vector<2x8x16xbf16>
    %228 = vector.extract_strided_slice %201 {offsets = [0, 0, 80], sizes = [2, 8, 16], strides = [1, 1, 1]} : vector<2x8x96xf32> to vector<2x8x16xf32>
    %229 = arith.truncf %228 : vector<2x8x16xf32> to vector<2x8x16xbf16>
    %cst_60 = arith.constant dense<0.000000e+00> : vector<2x8x8xf32>
    %230 = tpu.matmul %225, %227, %cst_60 {dimension_numbers = #tpu.dot_dimension_numbers<[2], [2], [1], [1], [0, 0, 0, 1, 1, 1], [0], [0]>} : vector<2x8x16xbf16>, vector<2x8x16xbf16>, vector<2x8x8xf32> -> vector<2x8x8xf32>
    %cst_61 = arith.constant 2.500000e-01 : f32
    %231 = vector.broadcast %cst_61 : f32 to vector<2x8x8xf32>
    %232 = arith.mulf %230, %231 : vector<2x8x8xf32>
    %233 = vector.broadcast %50 : vector<2x1x8xf32> to vector<2x8x8xf32>
    %234 = arith.addf %232, %233 : vector<2x8x8xf32>
    %cst_62 = arith.constant dense<0xFF800000> : vector<2x8xf32>
    %235 = vector.multi_reduction <maximumf>, %234, %cst_62 [2] : vector<2x8x8xf32> to vector<2x8xf32>
    %236 = vector.shape_cast %235 : vector<2x8xf32> to vector<2x8x1xf32>
    %237 = vector.broadcast %236 : vector<2x8x1xf32> to vector<2x8x8xf32>
    %238 = arith.subf %234, %237 : vector<2x8x8xf32>
    %239 = math.exp %238 : vector<2x8x8xf32>
    %cst_63 = arith.constant dense<0.000000e+00> : vector<2x8xf32>
    %240 = vector.multi_reduction <add>, %239, %cst_63 [2] : vector<2x8x8xf32> to vector<2x8xf32>
    %241 = vector.shape_cast %240 : vector<2x8xf32> to vector<2x8x1xf32>
    %242 = vector.broadcast %241 : vector<2x8x1xf32> to vector<2x8x8xf32>
    %243 = arith.divf %239, %242 : vector<2x8x8xf32>
    %244 = arith.truncf %243 : vector<2x8x8xf32> to vector<2x8x8xbf16>
    %cst_64 = arith.constant dense<0.000000e+00> : vector<2x8x16xf32>
    %245 = tpu.matmul %244, %229, %cst_64 {dimension_numbers = #tpu.dot_dimension_numbers<[2], [1], [1], [2], [0, 0, 0, 1, 1, 2], [0], [0]>} : vector<2x8x8xbf16>, vector<2x8x16xbf16>, vector<2x8x16xf32> -> vector<2x8x16xf32>
    %246 = tpu.concatenate %223, %245 in 2 : vector<2x8x16xf32>, vector<2x8x16xf32> -> vector<2x8x32xf32>
    %247 = vector.shape_cast %246 : vector<2x8x32xf32> to vector<16x32xf32>
    %248 = arith.truncf %247 : vector<16x32xf32> to vector<16x32xbf16>
    %c384 = arith.constant 384 : index
    %c0_65 = arith.constant 0 : index
    %249 = vector.load %arg4[%c384, %c0_65] : memref<592x128xf32, #tpu.memory_space<vmem>>, vector<32x32xf32>
    %250 = arith.truncf %249 : vector<32x32xf32> to vector<32x32xbf16>
    %cst_66 = arith.constant dense<0.000000e+00> : vector<16x32xf32>
    %251 = tpu.matmul %248, %250, %cst_66 {dimension_numbers = #tpu.dot_dimension_numbers<[1], [0], [0], [1], [0, 0, 1, 1], [], []>} : vector<16x32xbf16>, vector<32x32xbf16>, vector<16x32xf32> -> vector<16x32xf32>
    %252 = vector.broadcast %188 : vector<1x32xf32> to vector<16x32xf32>
    %253 = arith.addf %251, %252 : vector<16x32xf32>
    %254 = arith.addf %253, %185 : vector<16x32xf32>
    %cst_67 = arith.constant dense<0.000000e+00> : vector<16xf32>
    %255 = vector.multi_reduction <add>, %254, %cst_67 [1] : vector<16x32xf32> to vector<16xf32>
    %256 = vector.shape_cast %255 : vector<16xf32> to vector<16x1xf32>
    %cst_68 = arith.constant 3.200000e+01 : f32
    %257 = vector.broadcast %cst_68 : f32 to vector<16x1xf32>
    %258 = arith.divf %256, %257 : vector<16x1xf32>
    %259 = vector.broadcast %258 : vector<16x1xf32> to vector<16x32xf32>
    %260 = arith.subf %254, %259 : vector<16x32xf32>
    %261 = arith.mulf %260, %260 : vector<16x32xf32>
    %cst_69 = arith.constant dense<0.000000e+00> : vector<16xf32>
    %262 = vector.multi_reduction <add>, %261, %cst_69 [1] : vector<16x32xf32> to vector<16xf32>
    %263 = vector.shape_cast %262 : vector<16xf32> to vector<16x1xf32>
    %cst_70 = arith.constant 3.200000e+01 : f32
    %264 = vector.broadcast %cst_70 : f32 to vector<16x1xf32>
    %265 = arith.divf %263, %264 : vector<16x1xf32>
    %cst_71 = arith.constant 9.99999996E-13 : f32
    %266 = vector.broadcast %cst_71 : f32 to vector<16x1xf32>
    %267 = arith.addf %265, %266 : vector<16x1xf32>
    %268 = math.rsqrt %267 : vector<16x1xf32>
    %269 = vector.broadcast %268 : vector<16x1xf32> to vector<16x32xf32>
    %270 = arith.mulf %260, %269 : vector<16x32xf32>
    %271 = vector.broadcast %189 : vector<1x32xf32> to vector<16x32xf32>
    %272 = arith.mulf %270, %271 : vector<16x32xf32>
    %273 = vector.broadcast %190 : vector<1x32xf32> to vector<16x32xf32>
    %274 = arith.addf %272, %273 : vector<16x32xf32>
    %275 = arith.truncf %274 : vector<16x32xf32> to vector<16x32xbf16>
    %c416 = arith.constant 416 : index
    %c0_72 = arith.constant 0 : index
    %276 = vector.load %arg4[%c416, %c0_72] : memref<592x128xf32, #tpu.memory_space<vmem>>, vector<32x64xf32>
    %277 = arith.truncf %276 : vector<32x64xf32> to vector<32x64xbf16>
    %cst_73 = arith.constant dense<0.000000e+00> : vector<16x64xf32>
    %278 = tpu.matmul %275, %277, %cst_73 {dimension_numbers = #tpu.dot_dimension_numbers<[1], [0], [0], [1], [0, 0, 1, 1], [], []>} : vector<16x32xbf16>, vector<32x64xbf16>, vector<16x64xf32> -> vector<16x64xf32>
    %279 = vector.broadcast %191 : vector<1x64xf32> to vector<16x64xf32>
    %280 = arith.addf %278, %279 : vector<16x64xf32>
    %cst_74 = arith.constant 5.000000e-01 : f32
    %281 = vector.broadcast %cst_74 : f32 to vector<16x64xf32>
    %282 = arith.mulf %281, %280 : vector<16x64xf32>
    %cst_75 = arith.constant 4.471500e-02 : f32
    %283 = vector.broadcast %cst_75 : f32 to vector<16x64xf32>
    %284 = arith.mulf %283, %280 : vector<16x64xf32>
    %285 = arith.mulf %284, %280 : vector<16x64xf32>
    %286 = arith.mulf %285, %280 : vector<16x64xf32>
    %287 = arith.addf %280, %286 : vector<16x64xf32>
    %cst_76 = arith.constant 0.797884583 : f32
    %288 = vector.broadcast %cst_76 : f32 to vector<16x64xf32>
    %289 = arith.mulf %288, %287 : vector<16x64xf32>
    %290 = math.tanh %289 : vector<16x64xf32>
    %cst_77 = arith.constant 1.000000e+00 : f32
    %291 = vector.broadcast %cst_77 : f32 to vector<16x64xf32>
    %292 = arith.addf %291, %290 : vector<16x64xf32>
    %293 = arith.mulf %282, %292 : vector<16x64xf32>
    %294 = arith.truncf %293 : vector<16x64xf32> to vector<16x64xbf16>
    %c448 = arith.constant 448 : index
    %c0_78 = arith.constant 0 : index
    %295 = vector.load %arg4[%c448, %c0_78] : memref<592x128xf32, #tpu.memory_space<vmem>>, vector<64x32xf32>
    %296 = arith.truncf %295 : vector<64x32xf32> to vector<64x32xbf16>
    %cst_79 = arith.constant dense<0.000000e+00> : vector<16x32xf32>
    %297 = tpu.matmul %294, %296, %cst_79 {dimension_numbers = #tpu.dot_dimension_numbers<[1], [0], [0], [1], [0, 0, 1, 1], [], []>} : vector<16x64xbf16>, vector<64x32xbf16>, vector<16x32xf32> -> vector<16x32xf32>
    %298 = vector.broadcast %192 : vector<1x32xf32> to vector<16x32xf32>
    %299 = arith.addf %297, %298 : vector<16x32xf32>
    %300 = arith.addf %299, %274 : vector<16x32xf32>
    %cst_80 = arith.constant dense<0.000000e+00> : vector<16xf32>
    %301 = vector.multi_reduction <add>, %300, %cst_80 [1] : vector<16x32xf32> to vector<16xf32>
    %302 = vector.shape_cast %301 : vector<16xf32> to vector<16x1xf32>
    %cst_81 = arith.constant 3.200000e+01 : f32
    %303 = vector.broadcast %cst_81 : f32 to vector<16x1xf32>
    %304 = arith.divf %302, %303 : vector<16x1xf32>
    %305 = vector.broadcast %304 : vector<16x1xf32> to vector<16x32xf32>
    %306 = arith.subf %300, %305 : vector<16x32xf32>
    %307 = arith.mulf %306, %306 : vector<16x32xf32>
    %cst_82 = arith.constant dense<0.000000e+00> : vector<16xf32>
    %308 = vector.multi_reduction <add>, %307, %cst_82 [1] : vector<16x32xf32> to vector<16xf32>
    %309 = vector.shape_cast %308 : vector<16xf32> to vector<16x1xf32>
    %cst_83 = arith.constant 3.200000e+01 : f32
    %310 = vector.broadcast %cst_83 : f32 to vector<16x1xf32>
    %311 = arith.divf %309, %310 : vector<16x1xf32>
    %cst_84 = arith.constant 9.99999996E-13 : f32
    %312 = vector.broadcast %cst_84 : f32 to vector<16x1xf32>
    %313 = arith.addf %311, %312 : vector<16x1xf32>
    %314 = math.rsqrt %313 : vector<16x1xf32>
    %315 = vector.broadcast %314 : vector<16x1xf32> to vector<16x32xf32>
    %316 = arith.mulf %306, %315 : vector<16x32xf32>
    %317 = vector.broadcast %193 : vector<1x32xf32> to vector<16x32xf32>
    %318 = arith.mulf %316, %317 : vector<16x32xf32>
    %319 = vector.broadcast %194 : vector<1x32xf32> to vector<16x32xf32>
    %320 = arith.addf %318, %319 : vector<16x32xf32>
    %321 = vector.extract_strided_slice %320 {offsets = [0, 0], sizes = [1, 32], strides = [1, 1]} : vector<16x32xf32> to vector<1x32xf32>
    %322 = vector.extract_strided_slice %320 {offsets = [8, 0], sizes = [1, 32], strides = [1, 1]} : vector<16x32xf32> to vector<1x32xf32>
    %323 = tpu.concatenate %321, %322 in 0 : vector<1x32xf32>, vector<1x32xf32> -> vector<2x32xf32>
    %c584 = arith.constant 584 : index
    %c0_85 = arith.constant 0 : index
    %324 = vector.load %arg4[%c584, %c0_85] : memref<592x128xf32, #tpu.memory_space<vmem>>, vector<2x128xf32>
    %325 = arith.truncf %323 : vector<2x32xf32> to vector<2x32xbf16>
    %c520 = arith.constant 520 : index
    %c0_86 = arith.constant 0 : index
    %326 = vector.load %arg4[%c520, %c0_86] : memref<592x128xf32, #tpu.memory_space<vmem>>, vector<32x32xf32>
    %327 = arith.truncf %326 : vector<32x32xf32> to vector<32x32xbf16>
    %cst_87 = arith.constant dense<0.000000e+00> : vector<2x32xf32>
    %328 = tpu.matmul %325, %327, %cst_87 {dimension_numbers = #tpu.dot_dimension_numbers<[1], [0], [0], [1], [0, 0, 1, 1], [], []>} : vector<2x32xbf16>, vector<32x32xbf16>, vector<2x32xf32> -> vector<2x32xf32>
    %329 = vector.extract_strided_slice %324 {offsets = [0, 0], sizes = [1, 32], strides = [1, 1]} : vector<2x128xf32> to vector<1x32xf32>
    %330 = vector.broadcast %329 : vector<1x32xf32> to vector<2x32xf32>
    %331 = arith.addf %328, %330 : vector<2x32xf32>
    %332 = math.tanh %331 : vector<2x32xf32>
    %333 = arith.truncf %332 : vector<2x32xf32> to vector<2x32xbf16>
    %c552 = arith.constant 552 : index
    %c0_88 = arith.constant 0 : index
    %334 = vector.load %arg4[%c552, %c0_88] : memref<592x128xf32, #tpu.memory_space<vmem>>, vector<32x2xf32>
    %335 = arith.truncf %334 : vector<32x2xf32> to vector<32x2xbf16>
    %cst_89 = arith.constant dense<0.000000e+00> : vector<2x2xf32>
    %336 = tpu.matmul %333, %335, %cst_89 {dimension_numbers = #tpu.dot_dimension_numbers<[1], [0], [0], [1], [0, 0, 1, 1], [], []>} : vector<2x32xbf16>, vector<32x2xbf16>, vector<2x2xf32> -> vector<2x2xf32>
    %337 = vector.extract_strided_slice %324 {offsets = [1, 0], sizes = [1, 2], strides = [1, 1]} : vector<2x128xf32> to vector<1x2xf32>
    %338 = vector.broadcast %337 : vector<1x2xf32> to vector<2x2xf32>
    %339 = arith.addf %336, %338 : vector<2x2xf32>
    %cst_90 = arith.constant dense<0xFF800000> : vector<2xf32>
    %340 = vector.multi_reduction <maximumf>, %339, %cst_90 [1] : vector<2x2xf32> to vector<2xf32>
    %341 = vector.shape_cast %340 : vector<2xf32> to vector<2x1xf32>
    %342 = vector.broadcast %341 : vector<2x1xf32> to vector<2x2xf32>
    %343 = arith.subf %339, %342 : vector<2x2xf32>
    %344 = math.exp %343 : vector<2x2xf32>
    %cst_91 = arith.constant dense<0.000000e+00> : vector<2xf32>
    %345 = vector.multi_reduction <add>, %344, %cst_91 [1] : vector<2x2xf32> to vector<2xf32>
    %346 = vector.shape_cast %345 : vector<2xf32> to vector<2x1xf32>
    %347 = vector.broadcast %346 : vector<2x1xf32> to vector<2x2xf32>
    %348 = arith.divf %344, %347 : vector<2x2xf32>
    %349 = vector.broadcast %341 : vector<2x1xf32> to vector<2x2xf32>
    %350 = arith.subf %339, %349 : vector<2x2xf32>
    %351 = math.log %346 : vector<2x1xf32>
    %352 = vector.broadcast %351 : vector<2x1xf32> to vector<2x2xf32>
    %353 = arith.subf %350, %352 : vector<2x2xf32>
    %354 = tpu.iota {dimensions = array<i32: 1>} : vector<2x2xi32>
    %c0_92 = arith.constant 0 : index
    %c0_93 = arith.constant 0 : index
    %355 = vector.load %arg3[%c0_92, %c0_93] : memref<2x1xi32, #tpu.memory_space<vmem>>, vector<2x1xi32>
    %356 = vector.broadcast %355 : vector<2x1xi32> to vector<2x2xi32>
    %357 = arith.cmpi eq, %354, %356 : vector<2x2xi32>
    %358 = arith.extui %357 : vector<2x2xi1> to vector<2x2xi32>
    %359 = arith.sitofp %358 : vector<2x2xi32> to vector<2x2xf32>
    %360 = arith.mulf %359, %353 : vector<2x2xf32>
    %cst_94 = arith.constant dense<0.000000e+00> : vector<2xf32>
    %361 = vector.multi_reduction <add>, %360, %cst_94 [1] : vector<2x2xf32> to vector<2xf32>
    %362 = vector.shape_cast %361 : vector<2xf32> to vector<2x1xf32>
    %cst_95 = arith.constant 0.000000e+00 : f32
    %363 = vector.broadcast %cst_95 : f32 to vector<2x1xf32>
    %364 = arith.subf %363, %362 : vector<2x1xf32>
    %cst_96 = arith.constant dense<0.000000e+00> : vector<1xf32>
    %365 = vector.multi_reduction <add>, %364, %cst_96 [0] : vector<2x1xf32> to vector<1xf32>
    %366 = vector.shape_cast %365 : vector<1xf32> to vector<1x1xf32>
    %cst_97 = arith.constant 5.000000e-01 : f32
    %367 = vector.broadcast %cst_97 : f32 to vector<1x1xf32>
    %368 = arith.mulf %366, %367 : vector<1x1xf32>
    %369 = vector.shape_cast %368 : vector<1x1xf32> to vector<1x1xf32>
    %370 = vector.broadcast %369 : vector<1x1xf32> to vector<2x1xf32>
    %cst_98 = arith.constant 0.000000e+00 : f32
    %371 = vector.broadcast %cst_98 : f32 to vector<2x123xf32>
    %372 = tpu.concatenate %339, %348, %370, %371 in 1 : vector<2x2xf32>, vector<2x2xf32>, vector<2x1xf32>, vector<2x123xf32> -> vector<2x128xf32>
    %cst_99 = arith.constant 0.000000e+00 : f32
    %373 = vector.broadcast %cst_99 : f32 to vector<6x128xf32>
    %374 = tpu.concatenate %372, %373 in 0 : vector<2x128xf32>, vector<6x128xf32> -> vector<8x128xf32>
    %c0_100 = arith.constant 0 : index
    %c0_101 = arith.constant 0 : index
    %375 = vector.load %arg5[%c0_100, %c0_101] : memref<8x128xf32, #tpu.memory_space<vmem>>, vector<8x128xf32>
    tpu.vector_store %arg5[%c0_100, %c0_101], %374 {strides = array<i32>} : memref<8x128xf32, #tpu.memory_space<vmem>>, vector<8x128xf32>,
    return
  }
}

</mosaic_0001>

<bundles_post_ra>
// kernel: bert_forward.1
= control target key start
LH: loop header
LB: loop body
LE: loop exit
PB: predicated region body
PF: predicated region fallthrough
CT: control target
= control target key end

     0   :  { %10 = vsyncpa [#allocation3], 0  ;;  %s2447_s18 = smov [#allocation2]   ;;  %s2887_s0 = inlined_call_operand.vmem [shape: s32[16,1], index: 0, kind: input, shape index: {}]   ;;  %s2888_s1 = inlined_call_operand.vmem [shape: s32[16,1], index: 1, kind: input, shape index: {}]   ;;  %s2889_s2 = inlined_call_operand.vmem [shape: s32[2,1,8], index: 2, kind: input, shape index: {}]   ;;  %s2890_s3 = inlined_call_operand.vmem [shape: s32[2,1], index: 3, kind: input, shape index: {}]   ;;  %s2891_s4 = inlined_call_operand.hbm [shape: f32[592,128], index: 4, kind: input, shape index: {}]   ;;  %s2892_s5 = inlined_call_operand.vmem [shape: f32[8,128], index: 5, kind: output, shape index: {}]  }
   0x1   :  { %s24_s19 = sshll.u32 %s2447_s18, 4  ;;  %s2423_s22 = scalar_lea.hbm %s2891_s4, 9472  ;;  %s25_s19 = int_to_ptr.vmem [resolvable:$true] %s24_s19 }
   0x2   :  { %p2424_p0 = scmp.ne.s32.totalorder %s2891_s4, %s2423_s22  ;;  %p2427_p1 = scmp.lt.u32.totalorder %s2423_s22, %s2891_s4 }
   0x4   :  { %p2429_p2 = pnand %p2427_p1, %p2424_p0 }
   0x6   :  { %2432 = shalt.err (!%p2429_p2)
}
   0x7   :  { %s2433_s27 = scalar_lea.vmem %s25_s19, 9472  ;;  %p2438_p4 = scmp.lt.s32.totalorder %s25_s19, %s25_s19 }
   0x8   :  { %p2434_p3 = scmp.ne.s32.totalorder %s25_s19, %s2433_s27  ;;  %p2439_p5 = scmp.lt.s32.totalorder %s2433_s27, %s2433_s27 }
   0xa   :  { %p2440_p6 = por %p2439_p5, %p2438_p4 }
   0xc   :  { %p2441_p7 = pnand %p2440_p6, %p2434_p3 }
   0xe   :  { %2444 = shalt.err (!%p2441_p7)
}
   0xf   :  { %s2448_s28 = smov 128   ;;  %s2449_s29 = smov 8  }
  0x10   :  { %30 = dma.hbm_to_vmem [thread:$0]  %s2891_s4, 9472, %s25_s19, [#allocation3], %s2448_s28, %s2448_s28, %s2449_s29  }
  0x11   :  { %2445 = dma.done.wait [#allocation3], 9472  }
  0x12   :  { %2446 = vsyncadd [#allocation3], 4294957824  ;;  %v2450_v0 = vmov 0   ;;  %v35_v1 = vld [vmem:[%s2887_s0] sm:$0xff]  ;;  %v52_v3 = vld [vmem:[#allocation2 + $0x8] sm:$0xff]  ;;  %v2451_v9 = vmov 0.0   ;;  %v37_v27 = vlaneseq }
  0x13   :  { %2343 = vset.pattern.permute.xlu0 %v2450_v0  ;;  %2344 = vset.pattern.permute.xlu1 %v2450_v0  ;;  %v51_v2 = vld [vmem:[#allocation2] sm:$0xff]  ;;  %v53_v4 = vld [vmem:[#allocation2 + $0x10] sm:$0xff]  ;;  %v54_v5 = vld [vmem:[#allocation2 + $0x18] sm:$0xff]  ;;  %vm102_vm0 = vcmask 1043456   ;;  %vm95_vm1 = vcmask 818176   ;;  %vm183_vm4 = vcmask 261120  }
  0x14   :  { %40 = vperm.xlu0 %2343, %v35_v1   ;;  %v36_v6 = vld [vmem:[%s2887_s0 + $0x8] sm:$0xff]  ;;  %v2306_v7 = vpack.c.bf16 %v52_v3, %v51_v2  ;;  %v2310_v8 = vpack.c.bf16 %v54_v5, %v53_v4  ;;  %2122 = vmatprep.subr.bf16.mxu1 %v2451_v9  ;;  %v55_v10 = vld [vmem:[#allocation2 + $0x20] sm:$0xff]  ;;  %v57_v13 = vld [vmem:[#allocation2 + $0x30] sm:$0xff]  ;;  %v2518_v28 = vand.u32 127, %v37_v27  ;;  %v2524_v33 = vshrl.u32 %v37_v27, 7  ;;  %s2455_s17 = smov 80  }
  0x15   :  { %v56_v11 = vld [vmem:[#allocation2 + $0x28] sm:$0xff]  ;;  %v58_v14 = vld [vmem:[#allocation2 + $0x38] sm:$0xff]  ;;  %v65_v15 = vld [vmem:[%s2888_s1] sm:$0xff]  ;;  %vm2452_vm5 = vmmov 0   ;;  %vm292_vm6 = vcmask 130048   ;;  %vm404_vm7 = vcmask 64512  }
  0x16   :  { %2307 = vmatprep.subr.bf16.mxu0 %v2306_v7  ;;  %v2314_v12 = vpack.c.bf16 %v56_v11, %v55_v10  ;;  %v66_v16 = vld [vmem:[%s2888_s1 + $0x8] sm:$0xff]  ;;  %v67_v17 = vcvt.s32.f32 %v65_v15  ;;  %v2318_v18 = vpack.c.bf16 %v58_v14, %v57_v13  ;;  %v59_v20 = vld [vmem:[#allocation2 + $0x40] sm:$0xff]  ;;  %v61_v23 = vld [vmem:[#allocation2 + $0x50] sm:$0xff]  ;;  %v2527_v38 = vsub.s32 0, %v2524_v33  ;;  %2126 = vmatprep.mubr.msk.bf16.mxu1 %vm2452_vm5, %v2451_v9  ;;  %s2453_s1 = smov 96   ;;  %s2456_s18 = smov 112  }
  0x17   :  { %2309 = vmatpush3.bf16.msra.mxu0 %v2306_v7  ;;  %v68_v19 = vcvt.s32.f32 %v66_v16  ;;  %v60_v21 = vld [vmem:[#allocation2 + $0x48] sm:$0xff]  ;;  %v62_v24 = vld [vmem:[#allocation2 + $0x58] sm:$0xff]  ;;  %v63_v26 = vld [vmem:[#allocation2 + $0x60] sm:$0xf]  ;;  %s2457_s19 = smov 48   ;;  %s2458_s20 = smov 16  }
  0x18   :  { %43 = vperm.xlu0 %2343, %v36_v6   ;;  %2311 = vmatprep.subr.bf16.mxu0 %v2310_v8  ;;  %v2322_v22 = vpack.c.bf16 %v60_v21, %v59_v20  ;;  %v2326_v25 = vpack.c.bf16 %v62_v24, %v61_v23  ;;  %v69_v34 = vld [vmem:[#allocation2 + $0xa8] sm:$0x1]  ;;  %v70_v35 = vld [vmem:[#allocation2 + $0xa9] sm:$0x1]  ;;  %v233_v1 = vld [vmem:[#allocation2 + $0xb8] sm:$0xff]  ;;  %vm944_vm8 = vcmask 523264  }
  0x19   :  { %74 = vperm.xlu1 %2344, %v67_v17   ;;  %v71_v37 = vsub.f32 %v70_v35, %v69_v34  ;;  %v91_v41 = vrot.slane %v69_v34, %v2527_v38  ;;  %v64_v44 = vld [vmem:[#allocation2 + $0x68] sm:$0xff]  ;;  %v234_v2 = vld [vmem:[#allocation2 + $0xc0] sm:$0xff]  ;;  %v236_v5 = vld [vmem:[#allocation2 + $0xd0] sm:$0xff]  ;;  %vm1815_vm9 = vcmask 1040384   ;;  %vm1927_vm10 = vcmask 9216  }
  0x1a   :  { %v237_v3 = vpack.c.bf16 %v234_v2, %v233_v1  ;;  %v235_v4 = vld [vmem:[#allocation2 + $0xc8] sm:$0xff]  ;;  %v94_v14 = vld [vmem:[#allocation2 + $0xb0] sm:$0x3]  ;;  %v2555_v27 = vld [vmem:[#allocation2 + $0x158] sm:$0xff]  ;;  %vm1954_vm12 = vcmask 1041408   ;;  %vm1967_vm13 = vcmask 15360  }
  0x1b   :  { %2313 = vmatpush3.bf16.msra.mxu0 %v2310_v8  ;;  %v85_v39 = vrot.slane %v71_v37, %v2527_v38  ;;  %v238_v6 = vpack.c.bf16 %v236_v5, %v235_v4  ;;  %v214_v17 = vrot.slane %v94_v14, %v2527_v38  ;;  %vm1969_vm14 = vcmask 31744  }
  0x1c   :  { %2315 = vmatprep.subr.bf16.mxu0 %v2314_v12  ;;  %2123 = vmatpush3.bf16.msra.mxu1 %v237_v3  ;;  %vm1971_vm15 = vcmask 39936  }
  0x1d   :  { %79 = vperm.xlu1 %2344, %v68_v19   ;;  %2124 = vmatprep.subr.bf16.mxu1 %v2451_v9 }
  0x1f   :  { %2317 = vmatpush3.bf16.msra.mxu0 %v2314_v12 }
  0x20   :  { %2319 = vmatprep.subr.bf16.mxu0 %v2318_v18  ;;  %2125 = vmatpush3.bf16.msra.mxu1 %v238_v6 }
  0x21   :  { %2130 = vmatprep.subr.bf16.mxu1 %v2451_v9 }
  0x23   :  { %2321 = vmatpush3.bf16.msra.mxu0 %v2318_v18  ;;  %v2543_v18 = vsub.s32 1, %v2524_v33 }
  0x24   :  { %2323 = vmatprep.subr.bf16.mxu0 %v2322_v22 }
  0x27   :  { %2325 = vmatpush3.bf16.msra.mxu0 %v2322_v22  ;;  %v220_v22 = vrot.slane %v94_v14, %v2543_v18 }
  0x28   :  { %2327 = vmatprep.subr.bf16.mxu0 %v2326_v25 }
  0x2b   :  { %2329 = vmatpush3.bf16.msra.mxu0 %v2326_v25 }
  0x2c   :  { %2117 = vmatprep.subr.msk.mxu0 %vm102_vm0, %v63_v26 }
  0x2f   :  { %2118 = vmatpush3.msk.msra.mxu0 %vm102_vm0, %v63_v26 }
  0x30   :  { %2142 = vmatprep.subr.bf16.mxu0 %v2451_v9 }
  0x93   :  { %v41_v29 = vpop.permute.xlu0 %40 }
  0x94   :  { %vm45_vm2 = vcmp.eq.s32.totalorder %v2518_v28, %v41_v29  ;;  %v242_v29 = vrot.slane %v2555_v27, %v2527_v38 }
  0x95   :  { %v1980_v30 = vsel %vm45_vm2, 1.0, %v2451_v9 }
  0x96   :  { %2119 = vmatprep.mubr.msk.f32.mxu0 %vm95_vm1, %v1980_v30 }
  0x97   :  { %v44_v31 = vpop.permute.xlu0 %43 }
  0x98   :  { %vm46_vm3 = vcmp.eq.s32.totalorder %v2518_v28, %v44_v31  ;;  %v75_v36 = vpop.permute.xlu1 %74 }
  0x99   :  { %v1981_v32 = vsel %vm46_vm3, 1.0, %v2451_v9  ;;  %v86_v43 = vmul.f32 %v85_v39, %v75_v36 }
  0x9a   :  { %2120 = vmatmul.mubr.msk.f32.vlgmr.msra.gmra.mrb[0].mxu0 %vm95_vm1, %v1981_v32 }
  0x9b   :  { %v92_v46 = vadd.f32 %v91_v41, %v86_v43  ;;  %2144 = vmatprep.mubr.msk.bf16.mxu0 %vm2452_vm5, %v2451_v9 }
  0x9c   :  { %v80_v40 = vpop.permute.xlu1 %79 }
  0x9d   :  { %v87_v42 = vmul.f32 %v85_v39, %v80_v40 }
  0x9f   :  { %v93_v45 = vadd.f32 %v91_v41, %v87_v42 }
 0x16d   :  { %v2121_v47 = vpop.f32.mrb[0].mxu0 }
 0x16e   :  { %v178_v48 = vadd.f32 %v2121_v47, %v64_v44  ;;  %v172_v49 = vpop.f32.mrb[1].mxu0  ;;  %v224_v47 = vld [vmem:[%s2889_s2 + $0x1] sm:$0x1] }
 0x16f   :  { %v173_v50 = vadd.f32 %v172_v49, %v64_v44  ;;  %v223_v44 = vld [vmem:[%s2889_s2] sm:$0x1]  ;;  %v226_v49 = vcvt.s32.f32 %v224_v47  ;;  %s2454_s2 = smov 64  }
 0x170   :  { %v182_v51 = vadd.f32 %v178_v48, %v93_v45  ;;  %v225_v45 = vcvt.s32.f32 %v223_v44 }
 0x171   :  { %v181_v52 = vadd.f32 %v173_v50, %v92_v46 }
 0x172   :  { %v187_v53 = vsel %vm183_vm4, %v182_v51, 0.0  ;;  %v227_v46 = vsub.f32 1.0, %v225_v45 }
 0x173   :  { %188 = vadd.xlane.f32.xlu1 %v187_v53  ;;  %v184_v54 = vsel %vm183_vm4, %v181_v52, 0.0 }
 0x174   :  { %185 = vadd.xlane.f32.xlu0 %v184_v54  ;;  %v229_v48 = vmul.f32 -10000.0, %v227_v46 }
 0x176   :  { %v2586_v50 = vrot.slane %v229_v48, %v2527_v38 }
 0x200   :  { %v189_v55 = vpop.xlane.xlu1 %188 }
 0x201   :  { %v192_v56 = vmul.f32 0.03125, %v189_v55  ;;  %v186_v57 = vpop.xlane.xlu0 %185 }
 0x202   :  { %v191_v58 = vmul.f32 0.03125, %v186_v57 }
 0x203   :  { %v194_v59 = vsub.f32 %v182_v51, %v192_v56  ;;  %v228_v51 = vsub.f32 1.0, %v226_v49 }
 0x204   :  { %v193_v60 = vsub.f32 %v181_v52, %v191_v58 }
 0x205   :  { %v196_v63 = vmul.f32 %v194_v59, %v194_v59  ;;  %v230_v58 = vmul.f32 -10000.0, %v228_v51 }
 0x206   :  { %v195_v61 = vmul.f32 %v193_v60, %v193_v60 }
 0x207   :  { %v200_v0 = vsel %vm183_vm4, %v196_v63, 0.0 }
 0x208   :  { %v197_v62 = vsel %vm183_vm4, %v195_v61, 0.0 }
 0x209   :  { %198 = vadd.xlane.f32.xlu0 %v197_v62 }
 0x20d   :  { %201 = vadd.xlane.f32.xlu0 %v200_v0 }
 0x296   :  { %v199_v7 = vpop.xlane.xlu0 %198 }
 0x297   :  { %v203_v8 = vmul.f32 0.03125, %v199_v7 }
 0x299   :  { %v205_v10 = vadd.f32 1e-12, %v203_v8 }
 0x29a   :  { %v202_v11 = vpop.xlane.xlu0 %201 }
 0x29b   :  { %2355 = vrsqrt.f32 %v205_v10  ;;  %v204_v12 = vmul.f32 0.03125, %v202_v11 }
 0x29d   :  { %v206_v13 = vadd.f32 1e-12, %v204_v12 }
 0x29f   :  { %2357 = vrsqrt.f32 %v206_v13 }
 0x2a5   :  { %v2356_v15 = vpop.eup %2355 }
 0x2a6   :  { %v209_v16 = vmul.f32 %v2356_v15, %v193_v60  ;;  %v2591_v60 = vrot.slane %v230_v58, %v2527_v38 }
 0x2a8   :  { %v215_v21 = vmul.f32 %v214_v17, %v209_v16 }
 0x2a9   :  { %v2358_v19 = vpop.eup %2357 }
 0x2aa   :  { %v210_v20 = vmul.f32 %v2358_v19, %v194_v59  ;;  %v2546_v24 = vadd.f32 %v220_v22, %v215_v21 }
 0x2ac   :  { %v216_v23 = vmul.f32 %v214_v17, %v210_v20 }
 0x2ae   :  { %v2548_v25 = vadd.f32 %v220_v22, %v216_v23 }
 0x2b0   :  { %v232_v26 = vpack.c.bf16 %v2548_v25, %v2546_v24 }
 0x2b2   :  { %2127 = vmatmul.mubr.msk.bf16.vlgmr.msra.gmra.mrb[0].mxu1 %vm183_vm4, %v232_v26 }
 0x2b3   :  { %2132 = vmatprep.mubr.msk.bf16.mxu1 %vm2452_vm5, %v2451_v9 }
 0x385   :  { %v280_v30 = vpop.f32.mrb[0].mxu1 }
 0x386   :  { %v281_v31 = vadd.f32 %v280_v30, %v242_v29  ;;  %v2128_v32 = vpop.f32.mrb[1].mxu1 }
 0x387   :  { %v283_v34 = vpop.f32.mrb[2].mxu1 }
 0x388   :  { %v2559_v35 = vpack.c.bf16 %v281_v31, %v281_v31  ;;  %v284_v36 = vadd.f32 %v283_v34, %v242_v29  ;;  %v2129_v37 = vpop.f32.mrb[3].mxu1 }
 0x38a   :  { %v2561_v39 = vpack.c.bf16 %v284_v36, %v284_v36  ;;  %290 = vrot.lane.b32.xlu1 %v2559_v35, %s2453_s1 }
 0x38c   :  { %340 = vrot.lane.b32.xlu0 %v2561_v39, %s2453_s1 }
 0x3fc   :  { %v291_v40 = vpop.permute.xlu1 %290 }
 0x3fd   :  { %v297_v41 = vsel %vm292_vm6, %v291_v40, 0 }
 0x3fe   :  { %2131 = vmatpush3.bf16.xpose.msra.mxu1 %v297_v41  ;;  %v341_v42 = vpop.permute.xlu0 %340 }
 0x3ff   :  { %2136 = vmatprep.subr.bf16.mxu1 %v2451_v9  ;;  %v346_v43 = vsel %vm292_vm6, %v341_v42, 0 }
 0x405   :  { %2133 = vmatmul.mubr.msk.bf16.vlgmr.msra.gmra.mrb[4].mxu1 %vm292_vm6, %v2559_v35 }
 0x406   :  { %2137 = vmatpush3.bf16.xpose.msra.mxu1 %v346_v43  ;;  %2138 = vmatprep.mubr.msk.bf16.mxu1 %vm2452_vm5, %v2451_v9 }
 0x407   :  { %2148 = vmatprep.subr.bf16.mxu1 %v2451_v9 }
 0x40d   :  { %2139 = vmatmul.mubr.msk.bf16.vlgmr.msra.gmra.mrb[8].mxu1 %vm292_vm6, %v2561_v39 }
 0x40e   :  { %2150 = vmatprep.mubr.msk.bf16.mxu1 %vm2452_vm5, %v2451_v9 }
 0x4d8   :  { %v333_v52 = vpop.f32.mrb[4].mxu1 }
 0x4d9   :  { %v388_v53 = vmul.f32 0.25, %v333_v52  ;;  %v2134_v54 = vpop.f32.mrb[5].mxu1 }
 0x4da   :  { %v336_v55 = vpop.f32.mrb[6].mxu1 }
 0x4db   :  { %v2135_v56 = vpop.f32.mrb[7].mxu1  ;;  %v402_v57 = vadd.f32 %v2586_v50, %v388_v53 }
 0x4dd   :  { %v405_v59 = vsel %vm404_vm7, %v402_v57, -inf }
 0x4de   :  { %406 = vmax.xlane.f32.xlu1 %v405_v59 }
 0x4e0   :  { %v382_v61 = vpop.f32.mrb[8].mxu1 }
 0x4e1   :  { %v389_v62 = vmul.f32 0.25, %v382_v61  ;;  %v2140_v63 = vpop.f32.mrb[9].mxu1 }
 0x4e2   :  { %v385_v0 = vpop.f32.mrb[10].mxu1 }
 0x4e3   :  { %v2141_v1 = vpop.f32.mrb[11].mxu1  ;;  %v403_v2 = vadd.f32 %v2591_v60, %v389_v62 }
 0x4e5   :  { %v408_v3 = vsel %vm404_vm7, %v403_v2, -inf }
 0x4e6   :  { %409 = vmax.xlane.f32.xlu0 %v408_v3 }
 0x4ef   :  { %429 = vrot.lane.b32.xlu1 %v2559_v35, %s2454_s2 }
 0x56b   :  { %v407_v4 = vpop.xlane.xlu1 %406 }
 0x56c   :  { %v411_v5 = vsub.f32 %v402_v57, %v407_v4 }
 0x56e   :  { %v413_v6 = vmul.f32 1.442695, %v411_v5 }
 0x56f   :  { %v430_v7 = vpop.permute.xlu1 %429 }
 0x570   :  { %2359 = vpow2.f32 %v413_v6  ;;  %v435_v8 = vsel %vm102_vm0, %v430_v7, 0 }
 0x571   :  { %2143 = vmatpush3.bf16.msra.mxu0 %v435_v8 }
 0x572   :  { %2154 = vmatprep.subr.bf16.mxu0 %v2451_v9 }
 0x573   :  { %v410_v10 = vpop.xlane.xlu0 %409 }
 0x574   :  { %v412_v11 = vsub.f32 %v403_v2, %v410_v10 }
 0x576   :  { %v415_v12 = vmul.f32 1.442695, %v412_v11 }
 0x578   :  { %2361 = vpow2.f32 %v415_v12 }
 0x57a   :  { %v2360_v13 = vpop.eup %2359 }
 0x57b   :  { %v417_v14 = vsel %vm404_vm7, %v2360_v13, 0.0 }
 0x57c   :  { %418 = vadd.xlane.f32.xlu1 %v417_v14 }
 0x582   :  { %v2362_v15 = vpop.eup %2361 }
 0x583   :  { %v420_v16 = vsel %vm404_vm7, %v2362_v15, 0.0 }
 0x584   :  { %421 = vadd.xlane.f32.xlu0 %v420_v16 }
 0x58d   :  { %527 = vrot.lane.b32.xlu1 %v2559_v35, %s2455_s17 }
 0x591   :  { %577 = vrot.lane.b32.xlu1 %v2561_v39, %s2455_s17 }
 0x595   :  { %575 = vrot.lane.b32.xlu1 %v2561_v39, %s2456_s18 }
 0x59a   :  { %477 = vrot.lane.b32.xlu0 %v2561_v39, %s2454_s2 }
 0x59e   :  { %525 = vrot.lane.b32.xlu0 %v2559_v35, %s2456_s18 }
 0x609   :  { %v419_v17 = vpop.xlane.xlu1 %418 }
 0x60a   :  { %2363 = vrcp.f32 %v419_v17 }
 0x60d   :  { %v528_v23 = vpop.permute.xlu1 %527 }
 0x60e   :  { %v533_v30 = vsel %vm292_vm6, %v528_v23, 0 }
 0x611   :  { %v422_v19 = vpop.xlane.xlu0 %421  ;;  %v578_v34 = vpop.permute.xlu1 %577 }
 0x612   :  { %2365 = vrcp.f32 %v422_v19  ;;  %v583_v40 = vsel %vm292_vm6, %v578_v34, 0 }
 0x614   :  { %v2364_v20 = vpop.eup %2363 }
 0x615   :  { %v424_v21 = vmul.f32 %v2364_v20, %v2360_v13  ;;  %v478_v22 = vpop.permute.xlu0 %477  ;;  %v576_v41 = vpop.permute.xlu1 %575 }
 0x616   :  { %v483_v26 = vsel %vm102_vm0, %v478_v22, 0 }
 0x617   :  { %2149 = vmatpush3.bf16.msra.mxu1 %v483_v26  ;;  %v427_v29 = vpack.c.bf16 %v424_v21, %v424_v21  ;;  %v760_v26 = vld [vmem:[#allocation2 + $0xd8] sm:$0xff] }
 0x618   :  { %2160 = vmatprep.subr.bf16.mxu1 %v2451_v9 }
 0x619   :  { %2145 = vmatmul.mubr.msk.bf16.vlgmr.msra.gmra.mrb[4].mxu0 %vm404_vm7, %v427_v29  ;;  %v526_v37 = vpop.permute.xlu0 %525  ;;  %v761_v29 = vld [vmem:[#allocation2 + $0xe0] sm:$0xff] }
 0x61a   :  { %2155 = vmatpush3.bf16.xpose.msra.mxu0 %v533_v30  ;;  %2156 = vmatprep.mubr.msk.bf16.mxu0 %vm2452_vm5, %v2451_v9  ;;  %v764_v30 = vpack.c.bf16 %v761_v29, %v760_v26  ;;  %v850_v26 = vsub.s32 3, %v2524_v33 }
 0x61b   :  { %2166 = vmatprep.subr.bf16.mxu0 %v2451_v9 }
 0x61c   :  { %v2366_v31 = vpop.eup %2365 }
 0x61d   :  { %v426_v32 = vmul.f32 %v2366_v31, %v2362_v15  ;;  %v762_v31 = vld [vmem:[#allocation2 + $0xe8] sm:$0xff] }
 0x61f   :  { %v428_v36 = vpack.c.bf16 %v426_v32, %v426_v32  ;;  %v763_v32 = vld [vmem:[#allocation2 + $0xf0] sm:$0xff] }
 0x620   :  { %v765_v34 = vpack.c.bf16 %v763_v32, %v762_v31 }
 0x621   :  { %2151 = vmatmul.mubr.msk.bf16.vlgmr.msra.gmra.mrb[12].mxu1 %vm404_vm7, %v428_v36  ;;  %2157 = vmatmul.mubr.msk.bf16.vlgmr.msra.gmra.mrb[8].mxu0 %vm292_vm6, %v526_v37 }
 0x622   :  { %2161 = vmatpush3.bf16.xpose.msra.mxu1 %v583_v40  ;;  %2162 = vmatprep.mubr.msk.bf16.mxu1 %vm2452_vm5, %v2451_v9 }
 0x623   :  { %2172 = vmatprep.subr.bf16.mxu1 %v2451_v9  ;;  %2168 = vmatprep.mubr.msk.bf16.mxu0 %vm2452_vm5, %v2451_v9 }
 0x629   :  { %2163 = vmatmul.mubr.msk.bf16.vlgmr.msra.gmra.mrb[16].mxu1 %vm292_vm6, %v576_v41 }
 0x62a   :  { %2174 = vmatprep.mubr.msk.bf16.mxu1 %vm2452_vm5, %v2451_v9 }
 0x6ec   :  { %v2629_v42 = vpop.f32.mrb[4].mxu0 }
 0x6ed   :  { %v2146_v43 = vpop.f32.mrb[5].mxu0 }
 0x6ee   :  { %v474_v44 = vpop.f32.mrb[6].mxu0 }
 0x6ef   :  { %v2147_v45 = vpop.f32.mrb[7].mxu0 }
 0x6f4   :  { %v2631_v46 = vpop.f32.mrb[12].mxu1  ;;  %v569_v47 = vpop.f32.mrb[8].mxu0 }
 0x6f5   :  { %v625_v48 = vmul.f32 0.25, %v569_v47  ;;  %v2152_v49 = vpop.f32.mrb[13].mxu1  ;;  %v2158_v51 = vpop.f32.mrb[9].mxu0 }
 0x6f6   :  { %v522_v52 = vpop.f32.mrb[14].mxu1  ;;  %v572_v53 = vpop.f32.mrb[10].mxu0 }
 0x6f7   :  { %v2153_v54 = vpop.f32.mrb[15].mxu1  ;;  %v2159_v55 = vpop.f32.mrb[11].mxu0  ;;  %v627_v56 = vadd.f32 %v625_v48, %v2586_v50 }
 0x6f9   :  { %v629_v57 = vsel %vm404_vm7, %v627_v56, -inf }
 0x6fa   :  { %630 = vmax.xlane.f32.xlu0 %v629_v57 }
 0x6fc   :  { %v619_v58 = vpop.f32.mrb[16].mxu1 }
 0x6fd   :  { %v626_v59 = vmul.f32 0.25, %v619_v58  ;;  %v2164_v61 = vpop.f32.mrb[17].mxu1 }
 0x6fe   :  { %v622_v62 = vpop.f32.mrb[18].mxu1 }
 0x6ff   :  { %v2165_v63 = vpop.f32.mrb[19].mxu1  ;;  %v628_v0 = vadd.f32 %v626_v59, %v2591_v60 }
 0x701   :  { %v632_v1 = vsel %vm404_vm7, %v628_v0, -inf }
 0x702   :  { %633 = vmax.xlane.f32.xlu1 %v632_v1 }
 0x713   :  { %653 = vrot.lane.b32.xlu1 %v2559_v35, %s2457_s19 }
 0x787   :  { %v631_v2 = vpop.xlane.xlu0 %630 }
 0x788   :  { %v635_v3 = vsub.f32 %v627_v56, %v631_v2  ;;  %v769_v56 = vrot.slane %v2555_v27, %v2543_v18 }
 0x78a   :  { %v637_v4 = vmul.f32 1.442695, %v635_v3 }
 0x78c   :  { %2367 = vpow2.f32 %v637_v4 }
 0x78f   :  { %v634_v5 = vpop.xlane.xlu1 %633 }
 0x790   :  { %v636_v6 = vsub.f32 %v628_v0, %v634_v5 }
 0x792   :  { %v639_v7 = vmul.f32 1.442695, %v636_v6 }
 0x793   :  { %v654_v8 = vpop.permute.xlu1 %653 }
 0x794   :  { %2369 = vpow2.f32 %v639_v7  ;;  %v659_v10 = vsel %vm102_vm0, %v654_v8, 0 }
 0x795   :  { %2167 = vmatpush3.bf16.msra.mxu0 %v659_v10 }
 0x796   :  { %v2368_v11 = vpop.eup %2367  ;;  %2178 = vmatprep.subr.bf16.mxu0 %v2451_v9 }
 0x797   :  { %v641_v12 = vsel %vm404_vm7, %v2368_v11, 0.0 }
 0x798   :  { %642 = vadd.xlane.f32.xlu0 %v641_v12  ;;  %v855_v12 = vld [vmem:[#allocation2 + $0xf8] sm:$0xff] }
 0x79e   :  { %v2370_v13 = vpop.eup %2369 }
 0x79f   :  { %v644_v35 = vsel %vm404_vm7, %v2370_v13, 0.0 }
 0x7a0   :  { %645 = vadd.xlane.f32.xlu0 %v644_v35  ;;  %v857_v35 = vld [vmem:[#allocation2 + $0x108] sm:$0xff] }
 0x7b6   :  { %701 = vrot.lane.b32.xlu0 %v2561_v39, %s2457_s19 }
 0x825   :  { %v643_v14 = vpop.xlane.xlu0 %642 }
 0x826   :  { %2371 = vrcp.f32 %v643_v14  ;;  %v858_v14 = vld [vmem:[#allocation2 + $0x110] sm:$0xff] }
 0x82d   :  { %v646_v15 = vpop.xlane.xlu0 %645 }
 0x82e   :  { %2373 = vrcp.f32 %v646_v15  ;;  %v860_v15 = vpack.c.bf16 %v858_v14, %v857_v35 }
 0x830   :  { %v2372_v16 = vpop.eup %2371 }
 0x831   :  { %v648_v17 = vmul.f32 %v2372_v16, %v2368_v11  ;;  %v702_v19 = vpop.permute.xlu0 %701 }
 0x832   :  { %v707_v20 = vsel %vm102_vm0, %v702_v19, 0 }
 0x833   :  { %2173 = vmatpush3.bf16.msra.mxu1 %v707_v20  ;;  %v651_v21 = vpack.c.bf16 %v648_v17, %v648_v17 }
 0x834   :  { %2186 = vmatprep.subr.bf16.mxu1 %v2451_v9 }
 0x835   :  { %2169 = vmatmul.mubr.msk.bf16.vlgmr.msra.gmra.mrb[12].mxu0 %vm404_vm7, %v651_v21 }
 0x836   :  { %2182 = vmatprep.mubr.msk.bf16.mxu0 %vm2452_vm5, %v2451_v9  ;;  %2179 = vmatpush3.bf16.msra.mxu0 %v764_v30 }
 0x837   :  { %2180 = vmatprep.subr.bf16.mxu0 %v2451_v9 }
 0x838   :  { %v2374_v22 = vpop.eup %2373 }
 0x839   :  { %v650_v39 = vmul.f32 %v2374_v22, %v2370_v13 }
 0x83a   :  { %2181 = vmatpush3.bf16.msra.mxu0 %v765_v34 }
 0x83b   :  { %v652_v23 = vpack.c.bf16 %v650_v39, %v650_v39  ;;  %2194 = vmatprep.subr.bf16.mxu0 %v2451_v9  ;;  %v844_v39 = vsub.s32 2, %v2524_v33 }
 0x83d   :  { %2175 = vmatmul.mubr.msk.bf16.vlgmr.msra.gmra.mrb[20].mxu1 %vm404_vm7, %v652_v23  ;;  %v845_v23 = vrot.slane %v2555_v27, %v844_v39 }
 0x83e   :  { %2190 = vmatprep.mubr.msk.bf16.mxu1 %vm2452_vm5, %v2451_v9 }
 0x908   :  { %v695_v36 = vpop.f32.mrb[12].mxu0 }
 0x909   :  { %v2170_v37 = vpop.f32.mrb[13].mxu0 }
 0x90a   :  { %v698_v40 = vpop.f32.mrb[14].mxu0 }
 0x90b   :  { %v2171_v41 = vpop.f32.mrb[15].mxu0 }
 0x910   :  { %v743_v43 = vpop.f32.mrb[20].mxu1 }
 0x911   :  { %v2345_v44 = vpack.i.bf16 %v743_v43, %v695_v36  ;;  %v2176_v45 = vpop.f32.mrb[21].mxu1  ;;  %v851_v36 = vrot.slane %v2555_v27, %v850_v26 }
 0x912   :  { %v746_v47 = vpop.f32.mrb[22].mxu1  ;;  %v929_v45 = vld [vmem:[#allocation2 + $0x120] sm:$0xff] }
 0x913   :  { %2346 = vrot.lane.b32.xlu1 %v2345_v44, %s2458_s20  ;;  %v2177_v48 = vpop.f32.mrb[23].mxu1  ;;  %v928_v44 = vld [vmem:[#allocation2 + $0x118] sm:$0xff]  ;;  %v930_v47 = vld [vmem:[#allocation2 + $0x128] sm:$0xff] }
 0x914   :  { %v936_v48 = vpack.c.bf16 %v929_v45, %v928_v44 }
 0x985   :  { %v2347_v49 = vpop.permute.xlu1 %2346 }
 0x986   :  { %v2349_v51 = vunpack.i.h.bf16 %v2347_v49  ;;  %v2348_v52 = vunpack.i.l.bf16 %v2347_v49  ;;  %v931_v49 = vld [vmem:[#allocation2 + $0x130] sm:$0xff] }
 0x988   :  { %v758_v53 = vsel %vm292_vm6, %v2631_v46, %v2349_v51  ;;  %v757_v54 = vsel %vm292_vm6, %v2629_v42, %v2348_v52  ;;  %v937_v51 = vpack.c.bf16 %v931_v49, %v930_v47  ;;  %v932_v52 = vld [vmem:[#allocation2 + $0x138] sm:$0xff] }
 0x989   :  { %v759_v55 = vpack.c.bf16 %v758_v53, %v757_v54  ;;  %v933_v53 = vld [vmem:[#allocation2 + $0x140] sm:$0xff] }
 0x98a   :  { %v938_v54 = vpack.c.bf16 %v933_v53, %v932_v52 }
 0x98b   :  { %2183 = vmatmul.mubr.msk.bf16.vlgmr.msra.gmra.mrb[16].mxu0 %vm183_vm4, %v759_v55  ;;  %v934_v55 = vld [vmem:[#allocation2 + $0x148] sm:$0xff] }
 0x98c   :  { %2202 = vmatprep.mubr.msk.bf16.mxu0 %vm2452_vm5, %v2451_v9  ;;  %2195 = vmatpush3.bf16.msra.mxu0 %v936_v48 }
 0x98d   :  { %2196 = vmatprep.subr.bf16.mxu0 %v2451_v9 }
 0x990   :  { %2197 = vmatpush3.bf16.msra.mxu0 %v937_v51 }
 0x991   :  { %2198 = vmatprep.subr.bf16.mxu0 %v2451_v9 }
 0x994   :  { %2199 = vmatpush3.bf16.msra.mxu0 %v938_v54  ;;  %v1031_v54 = vld [vmem:[#allocation2 + $0x160] sm:$0xff] }
 0x995   :  { %2200 = vmatprep.subr.bf16.mxu0 %v2451_v9 }
 0xa5e   :  { %v807_v57 = vpop.f32.mrb[16].mxu0 }
 0xa5f   :  { %v808_v58 = vadd.f32 %v807_v57, %v769_v56  ;;  %v2184_v59 = vpop.f32.mrb[17].mxu0 }
 0xa60   :  { %v810_v61 = vpop.f32.mrb[18].mxu0 }
 0xa61   :  { %v811_v62 = vadd.f32 %v810_v61, %v769_v56  ;;  %v2185_v63 = vpop.f32.mrb[19].mxu0  ;;  %v814_v46 = vadd.f32 %v808_v58, %v2546_v24  ;;  %v935_v56 = vld [vmem:[#allocation2 + $0x150] sm:$0xff]  ;;  %v863_v58 = vsub.s32 4, %v2524_v33 }
 0xa62   :  { %v939_v57 = vpack.c.bf16 %v935_v56, %v934_v55  ;;  %v1033_v56 = vld [vmem:[#allocation2 + $0x170] sm:$0xff] }
 0xa63   :  { %v816_v0 = vsel %vm183_vm4, %v814_v46, 0.0  ;;  %v815_v42 = vadd.f32 %v811_v62, %v2548_v25  ;;  %v856_v25 = vld [vmem:[#allocation2 + $0x100] sm:$0xff]  ;;  %v864_v59 = vrot.slane %v2555_v27, %v863_v58 }
 0xa64   :  { %817 = vadd.xlane.f32.xlu1 %v816_v0  ;;  %v859_v13 = vpack.c.bf16 %v856_v25, %v855_v12  ;;  %2201 = vmatpush3.bf16.msra.mxu0 %v939_v57  ;;  %v1034_v57 = vld [vmem:[#allocation2 + $0x178] sm:$0xff] }
 0xa65   :  { %v819_v1 = vsel %vm183_vm4, %v815_v42, 0.0  ;;  %2220 = vmatprep.subr.bf16.mxu0 %v2451_v9 }
 0xa66   :  { %820 = vadd.xlane.f32.xlu0 %v819_v1  ;;  %2187 = vmatpush3.bf16.msra.mxu1 %v859_v13 }
 0xa67   :  { %2188 = vmatprep.subr.bf16.mxu1 %v2451_v9 }
 0xa6a   :  { %2189 = vmatpush3.bf16.msra.mxu1 %v860_v15 }
 0xa6b   :  { %2206 = vmatprep.subr.bf16.mxu1 %v2451_v9 }
 0xaf1   :  { %v818_v2 = vpop.xlane.xlu1 %817 }
 0xaf2   :  { %v822_v3 = vmul.f32 0.03125, %v818_v2 }
 0xaf3   :  { %v821_v4 = vpop.xlane.xlu0 %820 }
 0xaf4   :  { %v824_v5 = vsub.f32 %v814_v46, %v822_v3  ;;  %v823_v6 = vmul.f32 0.03125, %v821_v4 }
 0xaf6   :  { %v825_v7 = vsub.f32 %v815_v42, %v823_v6  ;;  %v826_v8 = vmul.f32 %v824_v5, %v824_v5 }
 0xaf8   :  { %v828_v10 = vsel %vm183_vm4, %v826_v8, 0.0  ;;  %v827_v11 = vmul.f32 %v825_v7, %v825_v7 }
 0xaf9   :  { %829 = vadd.xlane.f32.xlu0 %v828_v10 }
 0xafa   :  { %v831_v24 = vsel %vm183_vm4, %v827_v11, 0.0 }
 0xafb   :  { %832 = vadd.xlane.f32.xlu1 %v831_v24 }
 0xb86   :  { %v830_v16 = vpop.xlane.xlu0 %829 }
 0xb87   :  { %v834_v17 = vmul.f32 0.03125, %v830_v16 }
 0xb88   :  { %v833_v19 = vpop.xlane.xlu1 %832 }
 0xb89   :  { %v836_v20 = vadd.f32 1e-12, %v834_v17  ;;  %v835_v21 = vmul.f32 0.03125, %v833_v19  ;;  %v942_v19 = vsub.s32 5, %v2524_v33 }
 0xb8b   :  { %2375 = vrsqrt.f32 %v836_v20  ;;  %v837_v22 = vadd.f32 1e-12, %v835_v21  ;;  %v943_v20 = vrot.slane %v2555_v27, %v942_v19 }
 0xb8d   :  { %2377 = vrsqrt.f32 %v837_v22 }
 0xb95   :  { %v2376_v29 = vpop.eup %2375 }
 0xb96   :  { %v840_v30 = vmul.f32 %v2376_v29, %v824_v5 }
 0xb97   :  { %v2378_v31 = vpop.eup %2377 }
 0xb98   :  { %v846_v32 = vmul.f32 %v845_v23, %v840_v30  ;;  %v841_v34 = vmul.f32 %v2378_v31, %v825_v7 }
 0xb9a   :  { %v847_v37 = vmul.f32 %v845_v23, %v841_v34  ;;  %v2681_v40 = vadd.f32 %v851_v36, %v846_v32 }
 0xb9c   :  { %v2683_v41 = vadd.f32 %v851_v36, %v847_v37 }
 0xb9e   :  { %v854_v43 = vpack.c.bf16 %v2683_v41, %v2681_v40 }
 0xba0   :  { %2191 = vmatmul.mubr.msk.bf16.vlgmr.msra.gmra.mrb[24].mxu1 %vm183_vm4, %v854_v43 }
 0xba1   :  { %2210 = vmatprep.mubr.msk.bf16.mxu1 %vm2452_vm5, %v2451_v9 }
 0xc73   :  { %v902_v61 = vpop.f32.mrb[24].mxu1 }
 0xc74   :  { %v903_v62 = vadd.f32 %v902_v61, %v864_v59  ;;  %v2192_v63 = vpop.f32.mrb[25].mxu1 }
 0xc75   :  { %v905_v46 = vpop.f32.mrb[26].mxu1 }
 0xc76   :  { %v911_v0 = vmul.f32 0.044715, %v903_v62  ;;  %v906_v42 = vadd.f32 %v905_v46, %v864_v59  ;;  %v2193_v1 = vpop.f32.mrb[27].mxu1  ;;  %v909_v13 = vmul.f32 0.5, %v903_v62  ;;  %v1036_v59 = vpack.c.bf16 %v1034_v57, %v1033_v56 }
 0xc77   :  { %v1019_v1 = vsub.s32 6, %v2524_v33 }
 0xc78   :  { %v913_v2 = vmul.f32 %v911_v0, %v903_v62  ;;  %v912_v3 = vmul.f32 0.044715, %v906_v42  ;;  %v910_v35 = vmul.f32 0.5, %v906_v42 }
 0xc7a   :  { %v915_v4 = vmul.f32 %v913_v2, %v903_v62  ;;  %v914_v5 = vmul.f32 %v912_v3, %v906_v42  ;;  %v1020_v2 = vrot.slane %v2555_v27, %v1019_v1  ;;  %v1025_v3 = vsub.s32 7, %v2524_v33  ;;  %v1876_v33 = vld [vmem:[#allocation2 + $0x238] sm:$0xff] }
 0xc7c   :  { %v917_v6 = vadd.f32 %v915_v4, %v903_v62  ;;  %v916_v7 = vmul.f32 %v914_v5, %v906_v42 }
 0xc7e   :  { %v919_v8 = vmul.f32 0.7978846, %v917_v6  ;;  %v918_v10 = vadd.f32 %v916_v7, %v906_v42 }
 0xc80   :  { %2379 = vtanh.f32 %v919_v8  ;;  %v920_v11 = vmul.f32 0.7978846, %v918_v10  ;;  %v1026_v10 = vrot.slane %v2555_v27, %v1025_v3 }
 0xc82   :  { %2381 = vtanh.f32 %v920_v11 }
 0xc8a   :  { %v2380_v24 = vpop.eup %2379 }
 0xc8b   :  { %v923_v12 = vadd.f32 1.0, %v2380_v24 }
 0xc8c   :  { %v2382_v25 = vpop.eup %2381 }
 0xc8d   :  { %v924_v14 = vadd.f32 1.0, %v2382_v25  ;;  %v925_v15 = vmul.f32 %v923_v12, %v909_v13  ;;  %v2730_v13 = vld [vmem:[#allocation2 + $0x200] sm:$0xff] }
 0xc8f   :  { %v926_v16 = vmul.f32 %v924_v14, %v910_v35  ;;  %v1040_v35 = vrot.slane %v2730_v13, %v2527_v38 }
 0xc91   :  { %v927_v17 = vpack.c.bf16 %v926_v16, %v925_v15 }
 0xc93   :  { %2203 = vmatmul.mubr.msk.bf16.vlgmr.msra.gmra.mrb[20].mxu0 %vm944_vm8, %v927_v17 }
 0xc94   :  { %2222 = vmatprep.mubr.msk.bf16.mxu0 %vm2452_vm5, %v2451_v9 }
 0xd66   :  { %v982_v21 = vpop.f32.mrb[20].mxu0 }
 0xd67   :  { %v983_v22 = vadd.f32 %v982_v21, %v943_v20  ;;  %v2204_v23 = vpop.f32.mrb[21].mxu0 }
 0xd68   :  { %v985_v29 = vpop.f32.mrb[22].mxu0 }
 0xd69   :  { %v986_v30 = vadd.f32 %v985_v29, %v943_v20  ;;  %v2205_v31 = vpop.f32.mrb[23].mxu0  ;;  %v989_v32 = vadd.f32 %v983_v22, %v2681_v40 }
 0xd6b   :  { %v991_v34 = vsel %vm183_vm4, %v989_v32, 0.0  ;;  %v990_v36 = vadd.f32 %v986_v30, %v2683_v41  ;;  %v1032_v41 = vld [vmem:[#allocation2 + $0x168] sm:$0xff] }
 0xd6c   :  { %992 = vadd.xlane.f32.xlu0 %v991_v34  ;;  %v1035_v55 = vpack.c.bf16 %v1032_v41, %v1031_v54 }
 0xd6d   :  { %v994_v37 = vsel %vm183_vm4, %v990_v36, 0.0 }
 0xd6e   :  { %995 = vadd.xlane.f32.xlu1 %v994_v37  ;;  %2207 = vmatpush3.bf16.msra.mxu1 %v1035_v55 }
 0xd6f   :  { %2208 = vmatprep.subr.bf16.mxu1 %v2451_v9 }
 0xd72   :  { %2209 = vmatpush3.bf16.msra.mxu1 %v1036_v59 }
 0xd73   :  { %2214 = vmatprep.subr.bf16.mxu1 %v2451_v9 }
 0xdf9   :  { %v993_v43 = vpop.xlane.xlu0 %992 }
 0xdfa   :  { %v997_v44 = vmul.f32 0.03125, %v993_v43 }
 0xdfb   :  { %v996_v45 = vpop.xlane.xlu1 %995 }
 0xdfc   :  { %v999_v47 = vsub.f32 %v989_v32, %v997_v44  ;;  %v998_v48 = vmul.f32 0.03125, %v996_v45 }
 0xdfe   :  { %v1000_v49 = vsub.f32 %v990_v36, %v998_v48  ;;  %v1001_v51 = vmul.f32 %v999_v47, %v999_v47 }
 0xe00   :  { %v1003_v52 = vsel %vm183_vm4, %v1001_v51, 0.0  ;;  %v1002_v53 = vmul.f32 %v1000_v49, %v1000_v49 }
 0xe01   :  { %1004 = vadd.xlane.f32.xlu0 %v1003_v52 }
 0xe02   :  { %v1006_v40 = vsel %vm183_vm4, %v1002_v53, 0.0 }
 0xe03   :  { %1007 = vadd.xlane.f32.xlu1 %v1006_v40 }
 0xe8e   :  { %v1005_v61 = vpop.xlane.xlu0 %1004 }
 0xe8f   :  { %v1009_v62 = vmul.f32 0.03125, %v1005_v61 }
 0xe90   :  { %v1008_v63 = vpop.xlane.xlu1 %1007 }
 0xe91   :  { %v1011_v46 = vadd.f32 1e-12, %v1009_v62  ;;  %v1010_v0 = vmul.f32 0.03125, %v1008_v63 }
 0xe93   :  { %2383 = vrsqrt.f32 %v1011_v46  ;;  %v1012_v42 = vadd.f32 1e-12, %v1010_v0 }
 0xe95   :  { %2385 = vrsqrt.f32 %v1012_v42 }
 0xe9d   :  { %v2384_v4 = vpop.eup %2383 }
 0xe9e   :  { %v1015_v5 = vmul.f32 %v2384_v4, %v999_v47 }
 0xe9f   :  { %v2386_v6 = vpop.eup %2385 }
 0xea0   :  { %v1021_v7 = vmul.f32 %v1020_v2, %v1015_v5  ;;  %v1016_v8 = vmul.f32 %v2386_v6, %v1000_v49 }
 0xea2   :  { %v1022_v11 = vmul.f32 %v1020_v2, %v1016_v8  ;;  %v2721_v24 = vadd.f32 %v1026_v10, %v1021_v7 }
 0xea4   :  { %v2723_v12 = vadd.f32 %v1026_v10, %v1022_v11 }
 0xea6   :  { %v1030_v25 = vpack.c.bf16 %v2723_v12, %v2721_v24 }
 0xea8   :  { %2211 = vmatmul.mubr.msk.bf16.vlgmr.msra.gmra.mrb[28].mxu1 %vm183_vm4, %v1030_v25 }
 0xea9   :  { %2216 = vmatprep.mubr.msk.bf16.mxu1 %vm2452_vm5, %v2451_v9 }
 0xf7b   :  { %v1078_v14 = vpop.f32.mrb[28].mxu1 }
 0xf7c   :  { %v1079_v27 = vadd.f32 %v1078_v14, %v1040_v35  ;;  %v2212_v15 = vpop.f32.mrb[29].mxu1 }
 0xf7d   :  { %v1081_v16 = vpop.f32.mrb[30].mxu1 }
 0xf7e   :  { %v2734_v17 = vpack.c.bf16 %v1079_v27, %v1079_v27  ;;  %v1082_v20 = vadd.f32 %v1081_v16, %v1040_v35  ;;  %v2213_v21 = vpop.f32.mrb[31].mxu1 }
 0xf80   :  { %v2736_v22 = vpack.c.bf16 %v1082_v20, %v1082_v20  ;;  %1088 = vrot.lane.b32.xlu0 %v2734_v17, %s2453_s1 }
 0xf82   :  { %1137 = vrot.lane.b32.xlu1 %v2736_v22, %s2453_s1 }
 0xff2   :  { %v1089_v23 = vpop.permute.xlu0 %1088 }
 0xff3   :  { %v1094_v29 = vsel %vm292_vm6, %v1089_v23, 0 }
 0xff4   :  { %2215 = vmatpush3.bf16.xpose.msra.mxu1 %v1094_v29  ;;  %v1138_v30 = vpop.permute.xlu1 %1137 }
 0xff5   :  { %v1143_v31 = vsel %vm292_vm6, %v1138_v30, 0  ;;  %2226 = vmatprep.subr.bf16.mxu1 %v2451_v9 }
 0xff6   :  { %2221 = vmatpush3.bf16.xpose.msra.mxu0 %v1143_v31 }
 0xff7   :  { %2232 = vmatprep.subr.bf16.mxu0 %v2451_v9 }
 0xffb   :  { %2217 = vmatmul.mubr.msk.bf16.vlgmr.msra.gmra.mrb[32].mxu1 %vm292_vm6, %v2734_v17 }
 0xffc   :  { %2228 = vmatprep.mubr.msk.bf16.mxu1 %vm2452_vm5, %v2451_v9 }
 0xffd   :  { %2223 = vmatmul.mubr.msk.bf16.vlgmr.msra.gmra.mrb[24].mxu0 %vm292_vm6, %v2736_v22 }
 0xffe   :  { %2234 = vmatprep.mubr.msk.bf16.mxu0 %vm2452_vm5, %v2451_v9 }
0x10ce   :  { %v1130_v32 = vpop.f32.mrb[32].mxu1 }
0x10cf   :  { %v1185_v34 = vmul.f32 0.25, %v1130_v32  ;;  %v2218_v36 = vpop.f32.mrb[33].mxu1 }
0x10d0   :  { %v1133_v37 = vpop.f32.mrb[34].mxu1  ;;  %v1179_v43 = vpop.f32.mrb[24].mxu0 }
0x10d1   :  { %v1186_v44 = vmul.f32 0.25, %v1179_v43  ;;  %v2219_v45 = vpop.f32.mrb[35].mxu1  ;;  %v2224_v47 = vpop.f32.mrb[25].mxu0  ;;  %v1187_v48 = vadd.f32 %v1185_v34, %v2586_v50 }
0x10d2   :  { %v1182_v49 = vpop.f32.mrb[26].mxu0 }
0x10d3   :  { %v2225_v51 = vpop.f32.mrb[27].mxu0  ;;  %v1189_v52 = vsel %vm404_vm7, %v1187_v48, -inf  ;;  %v1188_v53 = vadd.f32 %v1186_v44, %v2591_v60 }
0x10d4   :  { %1190 = vmax.xlane.f32.xlu1 %v1189_v52 }
0x10d5   :  { %v1192_v40 = vsel %vm404_vm7, %v1188_v53, -inf }
0x10d6   :  { %1193 = vmax.xlane.f32.xlu0 %v1192_v40 }
0x10e5   :  { %1261 = vrot.lane.b32.xlu1 %v2736_v22, %s2454_s2 }
0x10ec   :  { %1213 = vrot.lane.b32.xlu0 %v2734_v17, %s2454_s2 }
0x1161   :  { %v1191_v54 = vpop.xlane.xlu1 %1190 }
0x1162   :  { %v1195_v41 = vsub.f32 %v1187_v48, %v1191_v54 }
0x1163   :  { %v1194_v55 = vpop.xlane.xlu0 %1193 }
0x1164   :  { %v1197_v56 = vmul.f32 1.442695, %v1195_v41  ;;  %v1196_v57 = vsub.f32 %v1188_v53, %v1194_v55 }
0x1165   :  { %v1262_v59 = vpop.permute.xlu1 %1261 }
0x1166   :  { %2387 = vpow2.f32 %v1197_v56  ;;  %v1199_v61 = vmul.f32 1.442695, %v1196_v57  ;;  %v1267_v62 = vsel %vm102_vm0, %v1262_v59, 0 }
0x1167   :  { %v1214_v63 = vpop.permute.xlu0 %1213  ;;  %2233 = vmatpush3.bf16.msra.mxu0 %v1267_v62 }
0x1168   :  { %2389 = vpow2.f32 %v1199_v61  ;;  %v1219_v46 = vsel %vm102_vm0, %v1214_v63, 0  ;;  %2244 = vmatprep.subr.bf16.mxu0 %v2451_v9 }
0x1169   :  { %2227 = vmatpush3.bf16.msra.mxu1 %v1219_v46 }
0x116a   :  { %2238 = vmatprep.subr.bf16.mxu1 %v2451_v9 }
0x1170   :  { %v2388_v0 = vpop.eup %2387 }
0x1171   :  { %v1201_v42 = vsel %vm404_vm7, %v2388_v0, 0.0 }
0x1172   :  { %v2390_v2 = vpop.eup %2389  ;;  %1202 = vadd.xlane.f32.xlu0 %v1201_v42 }
0x1173   :  { %v1204_v4 = vsel %vm404_vm7, %v2390_v2, 0.0 }
0x1174   :  { %1205 = vadd.xlane.f32.xlu1 %v1204_v4 }
0x1185   :  { %1311 = vrot.lane.b32.xlu1 %v2734_v17, %s2455_s17 }
0x1188   :  { %1361 = vrot.lane.b32.xlu0 %v2736_v22, %s2455_s17 }
0x1189   :  { %1309 = vrot.lane.b32.xlu1 %v2734_v17, %s2456_s18 }
0x118c   :  { %1359 = vrot.lane.b32.xlu0 %v2736_v22, %s2456_s18 }
0x11ff   :  { %v1203_v5 = vpop.xlane.xlu0 %1202 }
0x1200   :  { %2391 = vrcp.f32 %v1203_v5 }
0x1201   :  { %v1206_v6 = vpop.xlane.xlu1 %1205 }
0x1202   :  { %2393 = vrcp.f32 %v1206_v6 }
0x1203   :  { %v1362_v14 = vpop.permute.xlu0 %1361 }
0x1204   :  { %v1367_v16 = vsel %vm292_vm6, %v1362_v14, 0  ;;  %v1544_v14 = vld [vmem:[#allocation2 + $0x180] sm:$0xff] }
0x1205   :  { %v1312_v11 = vpop.permute.xlu1 %1311 }
0x1206   :  { %v1317_v27 = vsel %vm292_vm6, %v1312_v11, 0 }
0x1207   :  { %v1360_v21 = vpop.permute.xlu0 %1359 }
0x1209   :  { %v1310_v20 = vpop.permute.xlu1 %1309 }
0x120a   :  { %v2392_v7 = vpop.eup %2391 }
0x120b   :  { %v1208_v8 = vmul.f32 %v2392_v7, %v2388_v0 }
0x120c   :  { %v2394_v10 = vpop.eup %2393 }
0x120d   :  { %v1210_v25 = vmul.f32 %v2394_v10, %v2390_v2  ;;  %v1211_v35 = vpack.c.bf16 %v1208_v8, %v1208_v8 }
0x120f   :  { %2229 = vmatmul.mubr.msk.bf16.vlgmr.msra.gmra.mrb[36].mxu1 %vm404_vm7, %v1211_v35  ;;  %v1212_v15 = vpack.c.bf16 %v1210_v25, %v1210_v25 }
0x1210   :  { %2239 = vmatpush3.bf16.xpose.msra.mxu1 %v1317_v27  ;;  %2240 = vmatprep.mubr.msk.bf16.mxu1 %vm2452_vm5, %v2451_v9  ;;  %v1545_v27 = vld [vmem:[#allocation2 + $0x188] sm:$0xff] }
0x1211   :  { %2235 = vmatmul.mubr.msk.bf16.vlgmr.msra.gmra.mrb[28].mxu0 %vm404_vm7, %v1212_v15  ;;  %2250 = vmatprep.subr.bf16.mxu1 %v2451_v9  ;;  %v1548_v15 = vpack.c.bf16 %v1545_v27, %v1544_v14 }
0x1212   :  { %2245 = vmatpush3.bf16.xpose.msra.mxu0 %v1367_v16  ;;  %2246 = vmatprep.mubr.msk.bf16.mxu0 %vm2452_vm5, %v2451_v9  ;;  %v1546_v16 = vld [vmem:[#allocation2 + $0x190] sm:$0xff] }
0x1213   :  { %2256 = vmatprep.subr.bf16.mxu0 %v2451_v9 }
0x1217   :  { %2241 = vmatmul.mubr.msk.bf16.vlgmr.msra.gmra.mrb[40].mxu1 %vm292_vm6, %v1310_v20  ;;  %v1547_v20 = vld [vmem:[#allocation2 + $0x198] sm:$0xff] }
0x1218   :  { %2252 = vmatprep.mubr.msk.bf16.mxu1 %vm2452_vm5, %v2451_v9 }
0x1219   :  { %2247 = vmatmul.mubr.msk.bf16.vlgmr.msra.gmra.mrb[32].mxu0 %vm292_vm6, %v1360_v21  ;;  %v1549_v21 = vpack.c.bf16 %v1547_v20, %v1546_v16  ;;  %v1629_v16 = vrot.slane %v2730_v13, %v844_v39  ;;  %v1714_v39 = vld [vmem:[#allocation2 + $0x1d0] sm:$0xff] }
0x121a   :  { %2258 = vmatprep.mubr.msk.bf16.mxu0 %vm2452_vm5, %v2451_v9 }
0x12e2   :  { %v2792_v23 = vpop.f32.mrb[36].mxu1 }
0x12e3   :  { %v2230_v29 = vpop.f32.mrb[37].mxu1 }
0x12e4   :  { %v1258_v30 = vpop.f32.mrb[38].mxu1  ;;  %v2794_v31 = vpop.f32.mrb[28].mxu0 }
0x12e5   :  { %v2231_v32 = vpop.f32.mrb[39].mxu1  ;;  %v2236_v34 = vpop.f32.mrb[29].mxu0 }
0x12e6   :  { %v1306_v36 = vpop.f32.mrb[30].mxu0 }
0x12e7   :  { %v2237_v37 = vpop.f32.mrb[31].mxu0 }
0x12ea   :  { %v1353_v43 = vpop.f32.mrb[40].mxu1 }
0x12eb   :  { %v1409_v44 = vmul.f32 0.25, %v1353_v43  ;;  %v2242_v45 = vpop.f32.mrb[41].mxu1 }
0x12ec   :  { %v1356_v47 = vpop.f32.mrb[42].mxu1  ;;  %v1403_v48 = vpop.f32.mrb[32].mxu0 }
0x12ed   :  { %v1410_v49 = vmul.f32 0.25, %v1403_v48  ;;  %v2243_v51 = vpop.f32.mrb[43].mxu1  ;;  %v2248_v52 = vpop.f32.mrb[33].mxu0  ;;  %v1411_v53 = vadd.f32 %v1409_v44, %v2586_v50 }
0x12ee   :  { %v1406_v40 = vpop.f32.mrb[34].mxu0 }
0x12ef   :  { %v2249_v54 = vpop.f32.mrb[35].mxu0  ;;  %v1413_v41 = vsel %vm404_vm7, %v1411_v53, -inf  ;;  %v1412_v55 = vadd.f32 %v1410_v49, %v2591_v60  ;;  %v1553_v40 = vrot.slane %v2730_v13, %v2543_v18 }
0x12f0   :  { %1414 = vmax.xlane.f32.xlu1 %v1413_v41 }
0x12f1   :  { %v1416_v56 = vsel %vm404_vm7, %v1412_v55, -inf }
0x12f2   :  { %1417 = vmax.xlane.f32.xlu0 %v1416_v56 }
0x137d   :  { %v1415_v57 = vpop.xlane.xlu1 %1414 }
0x137e   :  { %v1419_v59 = vsub.f32 %v1411_v53, %v1415_v57 }
0x137f   :  { %v1418_v61 = vpop.xlane.xlu0 %1417 }
0x1380   :  { %v1421_v62 = vmul.f32 1.442695, %v1419_v59  ;;  %v1420_v63 = vsub.f32 %v1412_v55, %v1418_v61 }
0x1382   :  { %2395 = vpow2.f32 %v1421_v62  ;;  %v1423_v46 = vmul.f32 1.442695, %v1420_v63 }
0x1384   :  { %2397 = vpow2.f32 %v1423_v46 }
0x138c   :  { %v2396_v0 = vpop.eup %2395 }
0x138d   :  { %v1425_v50 = vsel %vm404_vm7, %v2396_v0, 0.0 }
0x138e   :  { %v2398_v42 = vpop.eup %2397  ;;  %1426 = vadd.xlane.f32.xlu0 %v1425_v50 }
0x138f   :  { %v1428_v2 = vsel %vm404_vm7, %v2398_v42, 0.0 }
0x1390   :  { %1429 = vadd.xlane.f32.xlu1 %v1428_v2 }
0x13a1   :  { %1485 = vrot.lane.b32.xlu1 %v2736_v22, %s2457_s19 }
0x13a4   :  { %1437 = vrot.lane.b32.xlu0 %v2734_v17, %s2457_s19 }
0x141b   :  { %v1427_v60 = vpop.xlane.xlu0 %1426 }
0x141c   :  { %2399 = vrcp.f32 %v1427_v60 }
0x141d   :  { %v1430_v4 = vpop.xlane.xlu1 %1429 }
0x141e   :  { %2401 = vrcp.f32 %v1430_v4 }
0x141f   :  { %v1438_v5 = vpop.permute.xlu0 %1437 }
0x1420   :  { %v1443_v6 = vsel %vm102_vm0, %v1438_v5, 0 }
0x1421   :  { %2251 = vmatpush3.bf16.msra.mxu1 %v1443_v6  ;;  %v1486_v7 = vpop.permute.xlu1 %1485  ;;  %v1639_v6 = vld [vmem:[#allocation2 + $0x1a0] sm:$0xff] }
0x1422   :  { %v1491_v8 = vsel %vm102_vm0, %v1486_v7, 0  ;;  %2262 = vmatprep.subr.bf16.mxu1 %v2451_v9 }
0x1423   :  { %2257 = vmatpush3.bf16.msra.mxu0 %v1491_v8  ;;  %v1641_v8 = vld [vmem:[#allocation2 + $0x1b0] sm:$0xff] }
0x1424   :  { %2270 = vmatprep.subr.bf16.mxu0 %v2451_v9 }
0x1426   :  { %v2400_v22 = vpop.eup %2399 }
0x1427   :  { %v1432_v10 = vmul.f32 %v2400_v22, %v2396_v0  ;;  %v1642_v22 = vld [vmem:[#allocation2 + $0x1b8] sm:$0xff] }
0x1428   :  { %v2402_v11 = vpop.eup %2401 }
0x1429   :  { %v1434_v17 = vmul.f32 %v2402_v11, %v2398_v42  ;;  %v1435_v25 = vpack.c.bf16 %v1432_v10, %v1432_v10  ;;  %v1644_v10 = vpack.c.bf16 %v1642_v22, %v1641_v8 }
0x142b   :  { %2253 = vmatmul.mubr.msk.bf16.vlgmr.msra.gmra.mrb[44].mxu1 %vm404_vm7, %v1435_v25  ;;  %v1436_v35 = vpack.c.bf16 %v1434_v17, %v1434_v17 }
0x142c   :  { %2266 = vmatprep.mubr.msk.bf16.mxu1 %vm2452_vm5, %v2451_v9  ;;  %2263 = vmatpush3.bf16.msra.mxu1 %v1548_v15 }
0x142d   :  { %2259 = vmatmul.mubr.msk.bf16.vlgmr.msra.gmra.mrb[36].mxu0 %vm404_vm7, %v1436_v35  ;;  %2264 = vmatprep.subr.bf16.mxu1 %v2451_v9 }
0x142e   :  { %2274 = vmatprep.mubr.msk.bf16.mxu0 %vm2452_vm5, %v2451_v9 }
0x1430   :  { %2265 = vmatpush3.bf16.msra.mxu1 %v1549_v21 }
0x1431   :  { %2278 = vmatprep.subr.bf16.mxu1 %v2451_v9 }
0x14fe   :  { %v1479_v29 = vpop.f32.mrb[44].mxu1 }
0x14ff   :  { %v2254_v30 = vpop.f32.mrb[45].mxu1 }
0x1500   :  { %v1482_v32 = vpop.f32.mrb[46].mxu1  ;;  %v1527_v34 = vpop.f32.mrb[36].mxu0 }
0x1501   :  { %v2350_v36 = vpack.i.bf16 %v1527_v34, %v1479_v29  ;;  %v2255_v37 = vpop.f32.mrb[47].mxu1  ;;  %v2260_v43 = vpop.f32.mrb[37].mxu0  ;;  %v1635_v32 = vrot.slane %v2730_v13, %v850_v26  ;;  %v1717_v26 = vld [vmem:[#allocation2 + $0x1e8] sm:$0xff] }
0x1502   :  { %v1530_v44 = vpop.f32.mrb[38].mxu0 }
0x1503   :  { %v2261_v45 = vpop.f32.mrb[39].mxu0  ;;  %2351 = vrot.lane.b32.xlu1 %v2350_v36, %s2458_s20  ;;  %v1712_v44 = vld [vmem:[#allocation2 + $0x1c0] sm:$0xff] }
0x1504   :  { %v1713_v45 = vld [vmem:[#allocation2 + $0x1c8] sm:$0xff] }
0x1575   :  { %v2352_v47 = vpop.permute.xlu1 %2351 }
0x1576   :  { %v2354_v48 = vunpack.i.h.bf16 %v2352_v47  ;;  %v2353_v49 = vunpack.i.l.bf16 %v2352_v47  ;;  %v1720_v47 = vpack.c.bf16 %v1713_v45, %v1712_v44 }
0x1578   :  { %v1542_v51 = vsel %vm292_vm6, %v2794_v31, %v2354_v48  ;;  %v1541_v52 = vsel %vm292_vm6, %v2792_v23, %v2353_v49  ;;  %v1715_v48 = vld [vmem:[#allocation2 + $0x1d8] sm:$0xff] }
0x1579   :  { %v1543_v53 = vpack.c.bf16 %v1542_v51, %v1541_v52  ;;  %v1721_v49 = vpack.c.bf16 %v1715_v48, %v1714_v39  ;;  %v1716_v51 = vld [vmem:[#allocation2 + $0x1e0] sm:$0xff]  ;;  %v1819_v48 = vld [vmem:[#allocation2 + $0x208] sm:$0xff] }
0x157a   :  { %v1722_v52 = vpack.c.bf16 %v1717_v26, %v1716_v51  ;;  %v1821_v51 = vld [vmem:[#allocation2 + $0x218] sm:$0xff]  ;;  %v1822_v26 = vld [vmem:[#allocation2 + $0x220] sm:$0xff] }
0x157b   :  { %2267 = vmatmul.mubr.msk.bf16.vlgmr.msra.gmra.mrb[48].mxu1 %vm183_vm4, %v1543_v53  ;;  %v1718_v53 = vld [vmem:[#allocation2 + $0x1f0] sm:$0xff] }
0x157c   :  { %2286 = vmatprep.mubr.msk.bf16.mxu1 %vm2452_vm5, %v2451_v9  ;;  %2279 = vmatpush3.bf16.msra.mxu1 %v1720_v47 }
0x157d   :  { %2280 = vmatprep.subr.bf16.mxu1 %v2451_v9 }
0x1580   :  { %2281 = vmatpush3.bf16.msra.mxu1 %v1721_v49 }
0x1581   :  { %2282 = vmatprep.subr.bf16.mxu1 %v2451_v9 }
0x1584   :  { %2283 = vmatpush3.bf16.msra.mxu1 %v1722_v52  ;;  %v1824_v52 = vpack.c.bf16 %v1822_v26, %v1821_v51 }
0x1585   :  { %2284 = vmatprep.subr.bf16.mxu1 %v2451_v9 }
0x164e   :  { %v1591_v54 = vpop.f32.mrb[48].mxu1 }
0x164f   :  { %v1592_v41 = vadd.f32 %v1591_v54, %v1553_v40  ;;  %v2268_v55 = vpop.f32.mrb[49].mxu1 }
0x1650   :  { %v1594_v56 = vpop.f32.mrb[50].mxu1 }
0x1651   :  { %v1595_v57 = vadd.f32 %v1594_v56, %v1553_v40  ;;  %v2269_v59 = vpop.f32.mrb[51].mxu1  ;;  %v1598_v31 = vadd.f32 %v1592_v41, %v2721_v24  ;;  %v1719_v40 = vld [vmem:[#allocation2 + $0x1f8] sm:$0xff]  ;;  %v1648_v41 = vrot.slane %v2730_v13, %v863_v58 }
0x1652   :  { %v1723_v54 = vpack.c.bf16 %v1719_v40, %v1718_v53 }
0x1653   :  { %v1600_v61 = vsel %vm183_vm4, %v1598_v31, 0.0  ;;  %v1599_v23 = vadd.f32 %v1595_v57, %v2723_v12  ;;  %v1640_v12 = vld [vmem:[#allocation2 + $0x1a8] sm:$0xff] }
0x1654   :  { %1601 = vadd.xlane.f32.xlu0 %v1600_v61  ;;  %v1643_v7 = vpack.c.bf16 %v1640_v12, %v1639_v6  ;;  %2285 = vmatpush3.bf16.msra.mxu1 %v1723_v54 }
0x1655   :  { %v1603_v62 = vsel %vm183_vm4, %v1599_v23, 0.0 }
0x1656   :  { %1604 = vadd.xlane.f32.xlu1 %v1603_v62  ;;  %2271 = vmatpush3.bf16.msra.mxu0 %v1643_v7 }
0x1657   :  { %2272 = vmatprep.subr.bf16.mxu0 %v2451_v9 }
0x165a   :  { %2273 = vmatpush3.bf16.msra.mxu0 %v1644_v10 }
0x165b   :  { %2290 = vmatprep.subr.bf16.mxu0 %v2451_v9 }
0x16e1   :  { %v1602_v63 = vpop.xlane.xlu0 %1601 }
0x16e2   :  { %v1606_v46 = vmul.f32 0.03125, %v1602_v63 }
0x16e3   :  { %v1605_v0 = vpop.xlane.xlu1 %1604 }
0x16e4   :  { %v1608_v50 = vsub.f32 %v1598_v31, %v1606_v46  ;;  %v1607_v42 = vmul.f32 0.03125, %v1605_v0 }
0x16e6   :  { %v1609_v2 = vsub.f32 %v1599_v23, %v1607_v42  ;;  %v1610_v60 = vmul.f32 %v1608_v50, %v1608_v50 }
0x16e8   :  { %v1612_v4 = vsel %vm183_vm4, %v1610_v60, 0.0  ;;  %v1611_v5 = vmul.f32 %v1609_v2, %v1609_v2 }
0x16e9   :  { %1613 = vadd.xlane.f32.xlu0 %v1612_v4 }
0x16ea   :  { %v1615_v24 = vsel %vm183_vm4, %v1611_v5, 0.0 }
0x16ed   :  { %1616 = vadd.xlane.f32.xlu0 %v1615_v24 }
0x1776   :  { %v1614_v11 = vpop.xlane.xlu0 %1613 }
0x1777   :  { %v1618_v17 = vmul.f32 0.03125, %v1614_v11  ;;  %v1727_v11 = vrot.slane %v2730_v13, %v942_v19 }
0x1779   :  { %v1620_v25 = vadd.f32 1e-12, %v1618_v17 }
0x177a   :  { %v1617_v35 = vpop.xlane.xlu0 %1616 }
0x177b   :  { %2403 = vrsqrt.f32 %v1620_v25  ;;  %v1619_v14 = vmul.f32 0.03125, %v1617_v35 }
0x177d   :  { %v1621_v27 = vadd.f32 1e-12, %v1619_v14 }
0x177f   :  { %2405 = vrsqrt.f32 %v1621_v27 }
0x1785   :  { %v2404_v15 = vpop.eup %2403 }
0x1786   :  { %v1624_v20 = vmul.f32 %v2404_v15, %v1608_v50 }
0x1788   :  { %v1630_v29 = vmul.f32 %v1629_v16, %v1624_v20 }
0x1789   :  { %v2406_v21 = vpop.eup %2405 }
0x178a   :  { %v1625_v30 = vmul.f32 %v2406_v21, %v1609_v2  ;;  %v1636_v36 = vadd.f32 %v1635_v32, %v1630_v29 }
0x178c   :  { %v1631_v34 = vmul.f32 %v1629_v16, %v1625_v30 }
0x178e   :  { %v1637_v37 = vadd.f32 %v1635_v32, %v1631_v34 }
0x1790   :  { %v1638_v43 = vpack.c.bf16 %v1637_v37, %v1636_v36 }
0x1792   :  { %2275 = vmatmul.mubr.msk.bf16.vlgmr.msra.gmra.mrb[40].mxu0 %vm183_vm4, %v1638_v43 }
0x1793   :  { %2294 = vmatprep.mubr.msk.bf16.mxu0 %vm2452_vm5, %v2451_v9 }
0x1865   :  { %v1686_v55 = vpop.f32.mrb[40].mxu0 }
0x1866   :  { %v1687_v56 = vadd.f32 %v1686_v55, %v1648_v41  ;;  %v2276_v57 = vpop.f32.mrb[41].mxu0 }
0x1867   :  { %v1689_v59 = vpop.f32.mrb[42].mxu0 }
0x1868   :  { %v1695_v31 = vmul.f32 0.044715, %v1687_v56  ;;  %v1690_v61 = vadd.f32 %v1689_v59, %v1648_v41  ;;  %v2277_v23 = vpop.f32.mrb[43].mxu0  ;;  %v1693_v6 = vmul.f32 0.5, %v1687_v56  ;;  %v1803_v59 = vrot.slane %v2730_v13, %v1019_v1  ;;  %v1874_v1 = vld [vmem:[#allocation2 + $0x228] sm:$0xff] }
0x186a   :  { %v1697_v62 = vmul.f32 %v1695_v31, %v1687_v56  ;;  %v1696_v63 = vmul.f32 0.044715, %v1690_v61  ;;  %v1694_v12 = vmul.f32 0.5, %v1690_v61 }
0x186c   :  { %v1699_v46 = vmul.f32 %v1697_v62, %v1687_v56  ;;  %v1698_v0 = vmul.f32 %v1696_v63, %v1690_v61  ;;  %v1809_v62 = vrot.slane %v2730_v13, %v1025_v3  ;;  %v1877_v3 = vld [vmem:[#allocation2 + $0x240] sm:$0xff] }
0x186d   :  { %v1879_v13 = vpack.c.bf16 %v1877_v3, %v1876_v33 }
0x186e   :  { %v1701_v50 = vadd.f32 %v1699_v46, %v1687_v56  ;;  %v1700_v42 = vmul.f32 %v1698_v0, %v1690_v61 }
0x1870   :  { %v1703_v2 = vmul.f32 0.7978846, %v1701_v50  ;;  %v1702_v60 = vadd.f32 %v1700_v42, %v1690_v61 }
0x1872   :  { %2407 = vtanh.f32 %v1703_v2  ;;  %v1704_v4 = vmul.f32 0.7978846, %v1702_v60 }
0x1874   :  { %2409 = vtanh.f32 %v1704_v4  ;;  %v1875_v4 = vld [vmem:[#allocation2 + $0x230] sm:$0xff] }
0x187c   :  { %v2408_v5 = vpop.eup %2407 }
0x187d   :  { %v1707_v58 = vadd.f32 1.0, %v2408_v5  ;;  %v1878_v5 = vpack.c.bf16 %v1875_v4, %v1874_v1 }
0x187e   :  { %v2410_v24 = vpop.eup %2409 }
0x187f   :  { %v1708_v7 = vadd.f32 1.0, %v2410_v24  ;;  %v1709_v8 = vmul.f32 %v1707_v58, %v1693_v6  ;;  %v1817_v58 = vld [vmem:[#allocation2 + $0x248] sm:$0x3] }
0x1880   :  { %v1828_v24 = vrot.slane %v1817_v58, %v2527_v38 }
0x1881   :  { %v1710_v22 = vmul.f32 %v1708_v7, %v1694_v12 }
0x1883   :  { %v1711_v10 = vpack.c.bf16 %v1710_v22, %v1709_v8 }
0x1885   :  { %2287 = vmatmul.mubr.msk.bf16.vlgmr.msra.gmra.mrb[52].mxu1 %vm944_vm8, %v1711_v10 }
0x1958   :  { %v1765_v17 = vpop.f32.mrb[52].mxu1 }
0x1959   :  { %v1766_v25 = vadd.f32 %v1765_v17, %v1727_v11  ;;  %v2288_v35 = vpop.f32.mrb[53].mxu1  ;;  %v1883_v17 = vrot.slane %v1817_v58, %v2543_v18 }
0x195a   :  { %v1768_v14 = vpop.f32.mrb[54].mxu1 }
0x195b   :  { %v1769_v27 = vadd.f32 %v1768_v14, %v1727_v11  ;;  %v2289_v15 = vpop.f32.mrb[55].mxu1  ;;  %v1772_v16 = vadd.f32 %v1766_v25, %v1636_v36 }
0x195d   :  { %v1774_v20 = vsel %vm183_vm4, %v1772_v16, 0.0  ;;  %v1773_v21 = vadd.f32 %v1769_v27, %v1637_v37  ;;  %v1820_v37 = vld [vmem:[#allocation2 + $0x210] sm:$0xff] }
0x195e   :  { %1775 = vadd.xlane.f32.xlu0 %v1774_v20  ;;  %v1823_v49 = vpack.c.bf16 %v1820_v37, %v1819_v48 }
0x195f   :  { %v1777_v29 = vsel %vm183_vm4, %v1773_v21, 0.0 }
0x1960   :  { %1778 = vadd.xlane.f32.xlu1 %v1777_v29  ;;  %2291 = vmatpush3.bf16.msra.mxu0 %v1823_v49 }
0x1961   :  { %2292 = vmatprep.subr.bf16.mxu0 %v2451_v9 }
0x1964   :  { %2293 = vmatpush3.bf16.msra.mxu0 %v1824_v52 }
0x1965   :  { %2298 = vmatprep.subr.bf16.mxu0 %v2451_v9 }
0x19eb   :  { %v1776_v30 = vpop.xlane.xlu0 %1775 }
0x19ec   :  { %v1780_v32 = vmul.f32 0.03125, %v1776_v30 }
0x19ed   :  { %v1779_v34 = vpop.xlane.xlu1 %1778 }
0x19ee   :  { %v1782_v43 = vsub.f32 %v1772_v16, %v1780_v32  ;;  %v1781_v44 = vmul.f32 0.03125, %v1779_v34  ;;  %v1942_v16 = vld [vmem:[%s2890_s3] sm:$0x3]  ;;  %s2459_s3 = smov 2  }
0x19f0   :  { %v1783_v19 = vsub.f32 %v1773_v21, %v1781_v44  ;;  %v1784_v45 = vmul.f32 %v1782_v43, %v1782_v43 }
0x19f2   :  { %v1786_v39 = vsel %vm183_vm4, %v1784_v45, 0.0  ;;  %v1785_v47 = vmul.f32 %v1783_v19, %v1783_v19 }
0x19f3   :  { %1787 = vadd.xlane.f32.xlu0 %v1786_v39 }
0x19f4   :  { %v1789_v36 = vsel %vm183_vm4, %v1785_v47, 0.0 }
0x19f5   :  { %1790 = vadd.xlane.f32.xlu1 %v1789_v36 }
0x1a80   :  { %v1788_v53 = vpop.xlane.xlu0 %1787 }
0x1a81   :  { %v1792_v40 = vmul.f32 0.03125, %v1788_v53 }
0x1a82   :  { %v1791_v54 = vpop.xlane.xlu1 %1790 }
0x1a83   :  { %v1794_v41 = vadd.f32 1e-12, %v1792_v40  ;;  %v1793_v55 = vmul.f32 0.03125, %v1791_v54 }
0x1a85   :  { %2411 = vrsqrt.f32 %v1794_v41  ;;  %v1795_v56 = vadd.f32 1e-12, %v1793_v55 }
0x1a87   :  { %2413 = vrsqrt.f32 %v1795_v56 }
0x1a8f   :  { %v2412_v57 = vpop.eup %2411 }
0x1a90   :  { %v1798_v31 = vmul.f32 %v2412_v57, %v1782_v43 }
0x1a91   :  { %v2414_v61 = vpop.eup %2413 }
0x1a92   :  { %v1799_v23 = vmul.f32 %v2414_v61, %v1783_v19  ;;  %v1804_v63 = vmul.f32 %v1803_v59, %v1798_v31 }
0x1a94   :  { %v1805_v46 = vmul.f32 %v1803_v59, %v1799_v23  ;;  %v1810_v50 = vadd.f32 %v1809_v62, %v1804_v63 }
0x1a96   :  { %v1811_v0 = vadd.f32 %v1809_v62, %v1805_v46 }
0x1a98   :  { %v1813_v42 = vrot.slane %v1811_v0, 7 }
0x1a9a   :  { %v1816_v2 = vsel %vm1815_vm9, %v1810_v50, %v1813_v42 }
0x1a9b   :  { %v1818_v60 = vpack.c.bf16 %v1816_v2, %v1816_v2 }
0x1a9d   :  { %2295 = vmatmul.mubr.msk.bf16.vlgmr.msra.gmra.mrb[44].mxu0 %vm183_vm4, %v1818_v60 }
0x1a9e   :  { %2302 = vmatprep.mubr.msk.bf16.mxu0 %vm2452_vm5, %v2451_v9  ;;  %2299 = vmatpush3.bf16.msra.mxu0 %v1878_v5 }
0x1a9f   :  { %2300 = vmatprep.subr.bf16.mxu0 %v2451_v9 }
0x1aa2   :  { %2301 = vmatpush3.bf16.msra.mxu0 %v1879_v13 }
0x1b70   :  { %v1866_v6 = vpop.f32.mrb[44].mxu0 }
0x1b71   :  { %v1867_v12 = vadd.f32 %v1866_v6, %v1828_v24  ;;  %v2296_v7 = vpop.f32.mrb[45].mxu0 }
0x1b72   :  { %v1869_v8 = vpop.f32.mrb[46].mxu0 }
0x1b73   :  { %2415 = vtanh.f32 %v1867_v12  ;;  %v2297_v22 = vpop.f32.mrb[47].mxu0 }
0x1b7d   :  { %v2416_v10 = vpop.eup %2415 }
0x1b7e   :  { %v1873_v11 = vpack.c.bf16 %v2416_v10, %v2416_v10 }
0x1b80   :  { %2303 = vmatmul.mubr.msk.bf16.vlgmr.msra.gmra.mrb[48].mxu0 %vm183_vm4, %v1873_v11 }
0x1c53   :  { %v1921_v25 = vpop.f32.mrb[48].mxu0 }
0x1c54   :  { %v1922_v35 = vadd.f32 %v1921_v25, %v1883_v17  ;;  %v2304_v14 = vpop.f32.mrb[49].mxu0 }
0x1c55   :  { %v1924_v27 = vpop.f32.mrb[50].mxu0 }
0x1c56   :  { %v2305_v15 = vpop.f32.mrb[51].mxu0  ;;  %v1928_v38 = vsel %vm1927_vm10, %v1922_v35, -inf }
0x1c57   :  { %1929 = vmax.xlane.f32.xlu1 %v1928_v38 }
0x1c68   :  { %1944 = vperm.xlu1 %2344, %v1942_v16  }
0x1ce4   :  { %v1930_v20 = vpop.xlane.xlu1 %1929 }
0x1ce5   :  { %v1931_v21 = vsub.f32 %v1922_v35, %v1930_v20 }
0x1ce7   :  { %v1932_v29 = vmul.f32 1.442695, %v1931_v21 }
0x1ce8   :  { %v1945_v34 = vpop.permute.xlu1 %1944 }
0x1ce9   :  { %2417 = vpow2.f32 %v1932_v29  ;;  %vm1946_vm11 = vcmp.eq.s32.totalorder %v2518_v28, %v1945_v34 }
0x1cea   :  { %v2011_v45 = vsel %vm1946_vm11, 1.0, %v2451_v9 }
0x1cf3   :  { %v2418_v30 = vpop.eup %2417 }
0x1cf4   :  { %v1934_v18 = vsel %vm1927_vm10, %v2418_v30, 0.0 }
0x1cf5   :  { %1935 = vadd.xlane.f32.xlu0 %v1934_v18 }
0x1d82   :  { %v1936_v32 = vpop.xlane.xlu0 %1935 }
0x1d83   :  { %2419 = vlog2.f32 %v1936_v32 }
0x1d84   :  { %2421 = vrcp.f32 %v1936_v32 }
0x1d8d   :  { %v2420_v43 = vpop.eup %2419 }
0x1d8e   :  { %v1940_v44 = vmul.f32 0.6931472, %v2420_v43  ;;  %v2422_v36 = vpop.eup %2421 }
0x1d8f   :  { %v1938_v48 = vmul.f32 %v2422_v36, %v2418_v30 }
0x1d90   :  { %v1941_v19 = vsub.f32 %v1931_v21, %v1940_v44 }
0x1d92   :  { %v1949_v39 = vmul.f32 %v2011_v45, %v1941_v19 }
0x1d94   :  { %v1950_v47 = vsel %vm1927_vm10, %v1949_v39, 0.0 }
0x1d95   :  { %1951 = vadd.xlane.f32.xlu0 %v1950_v47 }
0x1dab   :  { %1964 = vrot.lane.b32.xlu0 %v1938_v48, %s2459_s3 }
0x1e22   :  { %v1952_v37 = vpop.xlane.xlu0 %1951 }
0x1e23   :  { %v1953_v49 = vsub.f32 0.0, %v1952_v37 }
0x1e25   :  { %v1955_v51 = vsel %vm1954_vm12, %v1953_v49, 0.0 }
0x1e26   :  { %v1956_v26 = vrot.slane %v1955_v51, 4  ;;  %v1965_v54 = vpop.permute.xlu0 %1964 }
0x1e27   :  { %v1968_v55 = vsel %vm1967_vm13, %v1922_v35, %v1965_v54 }
0x1e28   :  { %v1957_v28 = vadd.f32 %v1956_v26, %v1955_v51 }
0x1e2a   :  { %v1958_v52 = vrot.slane %v1957_v28, 2 }
0x1e2c   :  { %v1959_v53 = vadd.f32 %v1958_v52, %v1957_v28 }
0x1e2e   :  { %v1960_v40 = vrot.slane %v1959_v53, 1 }
0x1e30   :  { %v1961_v9 = vadd.f32 %v1960_v40, %v1959_v53 }
0x1e32   :  { %v1962_v41 = vmul.f32 0.5, %v1961_v9 }
0x1e34   :  { %v1970_v56 = vsel %vm1969_vm14, %v1968_v55, %v1962_v41 }
0x1e35   :  { %v1972_v57 = vsel %vm1971_vm15, %v1970_v56, 0.0 }
0x1e36   :  { %v1973_v59 = vsel %vm1954_vm12, %v1972_v57, 0.0 }
0x1e37   :  { %1974 = vst [vmem:[%s2892_s5] sm:$0xff] %v1973_v59 }
0x1e38   :  { %1979 = vsyncpa [#allocation3], 1 }

</bundles_post_ra>
